<compile_context>
chip_gen: v5e
topology: v5e:2x2
jax: 0.10.0
libtpu: 0.0.40
codegen_flags: <defaults>
</compile_context>

<pallas_src>
import jax
import jax.numpy as jnp
import numpy as np
from jax.experimental import pallas as pl
from jax.experimental.pallas import tpu as pltpu


def _round_up(v, m):
    return -(-v // m) * m


# ---------------------------------------------------------------------------
# Fused Inception kernel (one grid step = NB images, batch flattened in lanes)
# ---------------------------------------------------------------------------
def _make_inception_kernel(H, W, NB, c1, c1p, c2_0, c2_1, c3_0, c3_1, c4,
                           cmid_p):
    HW = H * W
    L = NB * HW

    def kernel(x_ref, ws_ref, bs_ref, wb_ref, bb_ref, w4_ref, b4_ref, o_ref):
        x = x_ref[...]                                  # (Cin, NB*HW), lane-dense

        # Per-lane (row, col) coordinates within each image (border masks).
        idx = jax.lax.broadcasted_iota(jnp.int32, (1, L), 1)
        pos = (idx & (HW - 1)) if (HW & (HW - 1)) == 0 else (idx % HW)
        if (W & (W - 1)) == 0:                          # power-of-two fast path
            yy = pos >> (W.bit_length() - 1)
            xx = pos & (W - 1)
        else:
            yy = pos // W
            xx = pos % W

        # Factored border masks: one row mask per dy, one col mask per dx.
        row_ok = {dy: (yy >= -dy) & (yy < H - dy) for dy in (-2, -1, 1, 2)}
        col_ok = {dx: (xx >= -dx) & (xx < W - dx) for dx in (-2, -1, 1, 2)}
        mask_cache = {}

        def tap_mask(dy, dx):
            key = (dy, dx)
            if key not in mask_cache:
                if dy == 0:
                    m = col_ok[dx]
                elif dx == 0:
                    m = row_ok[dy]
                else:
                    m = row_ok[dy] & col_ok[dx]
                mask_cache[key] = m
            return mask_cache[key]

        def shifted(a, dy, dx, fill):
            # result[:, p] = a[:, p + dy*W + dx] inside each image, `fill`
            # outside.  XLU lane rotation + one VPU select; valid positions
            # never wrap across image boundaries so the cyclic roll is exact.
            if dy == 0 and dx == 0:
                return a
            k = dy * W + dx
            r = pltpu.roll(a, shift=(-k) % L, axis=1)
            return jnp.where(tap_mask(dy, dx), r, fill)

        # ---- fused 1x1 stem: p1 | p2_1 | p3_1 in one MXU pass over x -------
        h = jnp.dot(ws_ref[...], x, preferred_element_type=jnp.float32)
        h = jnp.maximum(h + bs_ref[...], 0.0)
        p1 = h[:c1]
        mid = h[c1p:c1p + cmid_p]       # [p2_1 out ; p3_1 out ; zero pad], 8-aligned

        # ---- 3x3 & 5x5 "same" convs: ONE tap-stacked matmul (im2col) -------
        # The shared "mid" slab is shifted once per 5x5 tap; the block weight
        # carries the 3x3 taps only on the inner ring (zeros elsewhere).
        pieces = [shifted(mid, t // 5 - 2, t % 5 - 2, 0.0) for t in range(25)]
        stack = jnp.concatenate(pieces, axis=0)         # (25*cmid_p, L), tile-aligned
        p23 = jnp.dot(wb_ref[...], stack, preferred_element_type=jnp.float32)
        p23 = jnp.maximum(p23 + bb_ref[...], 0.0)       # (c2_1 + c3_1, L)

        # ---- fused 3x3/s1/p1 max-pool + 1x1 conv + ReLU (p4 branch) --------
        neg = jnp.float32(-3.0e38)      # -inf stand-in; center tap always valid
        pooled = x
        for t in range(9):
            dy, dx = t // 3 - 1, t % 3 - 1
            if dy == 0 and dx == 0:
                continue
            pooled = jnp.maximum(pooled, shifted(x, dy, dx, neg))
        p4 = jnp.dot(w4_ref[...], pooled, preferred_element_type=jnp.float32)
        p4 = jnp.maximum(p4 + b4_ref[...], 0.0)

        # ---- concat-free, 8-sublane-aligned channel-slab stores ------------
        o_ref[:c1, :] = p1
        o_ref[c1:c1 + c2_1 + c3_1, :] = p23
        o_ref[c1 + c2_1 + c3_1:, :] = p4

    return kernel


def _pick_images_per_program(N, HW):
    # Batch several images into the lane axis of one grid step (amortize the
    # per-step overhead) while keeping >= 2 programs for v7x's two TensorCores.
    if N < 2:
        return max(N, 1)
    if HW % 128 != 0:
        return N            # lane block must equal the full dim to stay legal
    nb = 1
    for cand in range(2, min(8, N // 2) + 1):
        if N % cand == 0:
            nb = cand
    return nb


# ---------------------------------------------------------------------------
# Wrapper
# ---------------------------------------------------------------------------
@jax.jit
def inception_forward(x_nchw, params):
    N, Cin, H, W = x_nchw.shape
    HW = H * W

    c1 = params["p1_w"].shape[0]
    c2_0, c2_1 = params["p2_1_w"].shape[0], params["p2_2_w"].shape[0]
    c3_0, c3_1 = params["p3_1_w"].shape[0], params["p3_2_w"].shape[0]
    c4 = params["p4_2_w"].shape[0]
    c_total = c1 + c2_1 + c3_1 + c4

    # ---- tiny one-shot weight prep (a few KiB) -----------------------------
    c1p = _round_up(c1, 8)
    cmid = c2_0 + c3_0
    cmid_p = _round_up(cmid, 8)
    cs = c1p + cmid_p
    f32 = jnp.float32

    # Fused 1x1 stem weight: [p1 ; pad ; p2_1 ; p3_1 ; pad]  (8-aligned slabs)
    wstem = jnp.zeros((cs, Cin), f32)
    wstem = wstem.at[:c1].set(params["p1_w"].reshape(c1, Cin))
    wstem = wstem.at[c1p:c1p + c2_0].set(params["p2_1_w"].reshape(c2_0, Cin))
    wstem = wstem.at[c1p + c2_0:c1p + cmid].set(params["p3_1_w"].reshape(c3_0, Cin))
    bstem = jnp.zeros((cs,), f32)
    bstem = bstem.at[:c1].set(params["p1_b"])
    bstem = bstem.at[c1p:c1p + c2_0].set(params["p2_1_b"])
    bstem = bstem.at[c1p + c2_0:c1p + cmid].set(params["p3_1_b"])
    bstem = bstem[:, None]

    # Block weight for the shared tap-stacked matmul: tap t = ky*5 + kx reads
    # the shifted "mid" slab; the 3x3 kernel is spatially zero-padded to 5x5 so
    # both branches index the same 25 taps.
    w3 = jnp.transpose(params["p2_2_w"], (0, 2, 3, 1))            # (c2_1,3,3,c2_0)
    w3 = jnp.pad(w3, ((0, 0), (1, 1), (1, 1), (0, 0)))            # (c2_1,5,5,c2_0)
    w5 = jnp.transpose(params["p3_2_w"], (0, 2, 3, 1))            # (c3_1,5,5,c3_0)
    wbig = jnp.zeros((c2_1 + c3_1, 25, cmid_p), f32)
    wbig = wbig.at[:c2_1, :, :c2_0].set(w3.reshape(c2_1, 25, c2_0))
    wbig = wbig.at[c2_1:, :, c2_0:cmid].set(w5.reshape(c3_1, 25, c3_0))
    wbig = wbig.reshape(c2_1 + c3_1, 25 * cmid_p)
    bbig = jnp.concatenate([params["p2_2_b"], params["p3_2_b"]])[:, None]

    w4 = params["p4_2_w"].reshape(c4, Cin)
    b4 = params["p4_2_b"][:, None]

    # ---- channels-first, batch flattened into lanes: (Cin, N*HW) -----------
    x_cl = x_nchw.reshape(N, Cin, HW).transpose(1, 0, 2).reshape(Cin, N * HW)

    nb = _pick_images_per_program(N, HW)
    num_prog = N // nb
    lanes = nb * HW

    kernel = _make_inception_kernel(H, W, nb, c1, c1p, c2_0, c2_1, c3_0, c3_1,
                                    c4, cmid_p)

    out = pl.pallas_call(
        kernel,
        grid=(num_prog,),
        in_specs=[
            pl.BlockSpec((Cin, lanes), lambda g: (0, g)),
            pl.BlockSpec(wstem.shape, lambda g: (0, 0)),
            pl.BlockSpec(bstem.shape, lambda g: (0, 0)),
            pl.BlockSpec(wbig.shape, lambda g: (0, 0)),
            pl.BlockSpec(bbig.shape, lambda g: (0, 0)),
            pl.BlockSpec(w4.shape, lambda g: (0, 0)),
            pl.BlockSpec(b4.shape, lambda g: (0, 0)),
        ],
        out_specs=pl.BlockSpec((c_total, lanes), lambda g: (0, g)),
        out_shape=jax.ShapeDtypeStruct((c_total, N * HW), jnp.float32),
        compiler_params=pltpu.CompilerParams(
            dimension_semantics=("parallel",),
            vmem_limit_bytes=32 * 1024 * 1024,
        ),
    )(x_cl, wstem, bstem, wbig, bbig, w4, b4)

    return out.reshape(c_total, N, HW).transpose(1, 0, 2).reshape(N, c_total, H, W)


# ---------------------------------------------------------------------------
# Pure-JAX reference (verification only)
# ---------------------------------------------------------------------------
def _conv_ref(x, w, b, pad):
    y = jax.lax.conv_general_dilated(
        x, w, (1, 1), ((pad, pad), (pad, pad)),
        dimension_numbers=("NCHW", "OIHW", "NCHW"),
    )
    return jax.nn.relu(y + b[None, :, None, None])


def inception_ref(x, params):
    p1 = _conv_ref(x, params["p1_w"], params["p1_b"], 0)
    p2 = _conv_ref(x, params["p2_1_w"], params["p2_1_b"], 0)
    p2 = _conv_ref(p2, params["p2_2_w"], params["p2_2_b"], 1)
    p3 = _conv_ref(x, params["p3_1_w"], params["p3_1_b"], 0)
    p3 = _conv_ref(p3, params["p3_2_w"], params["p3_2_b"], 2)
    p4 = jax.lax.reduce_window(
        x, -jnp.inf, jax.lax.max, (1, 1, 3, 3), (1, 1, 1, 1),
        ((0, 0), (0, 0), (1, 1), (1, 1)),
    )
    p4 = _conv_ref(p4, params["p4_2_w"], params["p4_2_b"], 0)
    return jnp.concatenate((p1, p2, p3, p4), axis=1)


# ---------------------------------------------------------------------------
# Main
# ---------------------------------------------------------------------------
if __name__ == "__main__":
    key = jax.random.PRNGKey(0)

    # Module config (small, consistent with Inception(__init__) shapes).
    in_channels, c1, c2, c3, c4 = 4, 8, (4, 8), (4, 8), 8
    N, H, W = 2, 16, 16

    def init_conv(k, cout, cin, ks):
        kw, kb = jax.random.split(k)
        w = 0.1 * jax.random.normal(kw, (cout, cin, ks, ks), jnp.float32)
        b = 0.1 * jax.random.normal(kb, (cout,), jnp.float32)
        return w, b

    keys = jax.random.split(key, 7)
    params = {}
    params["p1_w"], params["p1_b"] = init_conv(keys[0], c1, in_channels, 1)
    params["p2_1_w"], params["p2_1_b"] = init_conv(keys[1], c2[0], in_channels, 1)
    params["p2_2_w"], params["p2_2_b"] = init_conv(keys[2], c2[1], c2[0], 3)
    params["p3_1_w"], params["p3_1_b"] = init_conv(keys[3], c3[0], in_channels, 1)
    params["p3_2_w"], params["p3_2_b"] = init_conv(keys[4], c3[1], c3[0], 5)
    params["p4_2_w"], params["p4_2_b"] = init_conv(keys[5], c4, in_channels, 1)

    x = jax.random.normal(keys[6], (N, in_channels, H, W), jnp.float32)

    out = jax.block_until_ready(inception_forward(x, params))

    expected_channels = c1 + c2[1] + c3[1] + c4
    assert out.shape == (N, expected_channels, H, W), out.shape

    ref = jax.block_until_ready(inception_ref(x, params))
    np.testing.assert_allclose(np.asarray(out), np.asarray(ref), rtol=1e-3, atol=1e-3)

    print("KERNEL_OK")
</pallas_src>

<mosaic_0001>
module attributes {stable_mosaic.version = 11 : i64} {
  func.func @kernel(%arg0: i32, %arg1: memref<4x256xf32, #tpu.memory_space<vmem>>, %arg2: memref<16x4xf32, #tpu.memory_space<vmem>>, %arg3: memref<16x1xf32, #tpu.memory_space<vmem>>, %arg4: memref<16x200xf32, #tpu.memory_space<vmem>>, %arg5: memref<16x1xf32, #tpu.memory_space<vmem>>, %arg6: memref<8x4xf32, #tpu.memory_space<vmem>>, %arg7: memref<8x1xf32, #tpu.memory_space<vmem>>, %arg8: memref<32x256xf32, #tpu.memory_space<vmem>>) attributes {dimension_semantics = [#tpu.dimension_semantics<parallel>], iteration_bounds = array<i64: 2>, scalar_prefetch = 0 : i64, scratch_operands = 0 : i64, tpu.core_type = #tpu.core_type<tc>, window_params = [{transform_indices = @transform_0, window_bounds = array<i64: 4, 256>}, {pipeline_mode = #tpu.pipeline_mode<synchronous>, transform_indices = @transform_1, window_bounds = array<i64: 16, 4>}, {pipeline_mode = #tpu.pipeline_mode<synchronous>, transform_indices = @transform_2, window_bounds = array<i64: 16, 1>}, {pipeline_mode = #tpu.pipeline_mode<synchronous>, transform_indices = @transform_3, window_bounds = array<i64: 16, 200>}, {pipeline_mode = #tpu.pipeline_mode<synchronous>, transform_indices = @transform_4, window_bounds = array<i64: 16, 1>}, {pipeline_mode = #tpu.pipeline_mode<synchronous>, transform_indices = @transform_5, window_bounds = array<i64: 8, 4>}, {pipeline_mode = #tpu.pipeline_mode<synchronous>, transform_indices = @transform_6, window_bounds = array<i64: 8, 1>}, {transform_indices = @transform_7, window_bounds = array<i64: 32, 256>}]} {
    %c0 = arith.constant 0 : index
    %c0_0 = arith.constant 0 : index
    %0 = vector.load %arg1[%c0, %c0_0] : memref<4x256xf32, #tpu.memory_space<vmem>>, vector<4x256xf32>
    %1 = tpu.iota {dimensions = array<i32: 1>} : vector<1x256xi32>
    %c255_i32 = arith.constant 255 : i32
    %2 = vector.broadcast %c255_i32 : i32 to vector<1x256xi32>
    %3 = arith.andi %1, %2 : vector<1x256xi32>
    %c4_i32 = arith.constant 4 : i32
    %4 = vector.broadcast %c4_i32 : i32 to vector<1x256xi32>
    %5 = arith.shrsi %3, %4 : vector<1x256xi32>
    %c15_i32 = arith.constant 15 : i32
    %6 = vector.broadcast %c15_i32 : i32 to vector<1x256xi32>
    %7 = arith.andi %3, %6 : vector<1x256xi32>
    %c2_i32 = arith.constant 2 : i32
    %8 = vector.broadcast %c2_i32 : i32 to vector<1x256xi32>
    %9 = arith.cmpi sge, %5, %8 : vector<1x256xi32>
    %c18_i32 = arith.constant 18 : i32
    %10 = vector.broadcast %c18_i32 : i32 to vector<1x256xi32>
    %11 = arith.cmpi slt, %5, %10 : vector<1x256xi32>
    %12 = arith.andi %9, %11 : vector<1x256xi1>
    %c1_i32 = arith.constant 1 : i32
    %13 = vector.broadcast %c1_i32 : i32 to vector<1x256xi32>
    %14 = arith.cmpi sge, %5, %13 : vector<1x256xi32>
    %c17_i32 = arith.constant 17 : i32
    %15 = vector.broadcast %c17_i32 : i32 to vector<1x256xi32>
    %16 = arith.cmpi slt, %5, %15 : vector<1x256xi32>
    %17 = arith.andi %14, %16 : vector<1x256xi1>
    %c-1_i32 = arith.constant -1 : i32
    %18 = vector.broadcast %c-1_i32 : i32 to vector<1x256xi32>
    %19 = arith.cmpi sge, %5, %18 : vector<1x256xi32>
    %c15_i32_1 = arith.constant 15 : i32
    %20 = vector.broadcast %c15_i32_1 : i32 to vector<1x256xi32>
    %21 = arith.cmpi slt, %5, %20 : vector<1x256xi32>
    %22 = arith.andi %19, %21 : vector<1x256xi1>
    %c-2_i32 = arith.constant -2 : i32
    %23 = vector.broadcast %c-2_i32 : i32 to vector<1x256xi32>
    %24 = arith.cmpi sge, %5, %23 : vector<1x256xi32>
    %c14_i32 = arith.constant 14 : i32
    %25 = vector.broadcast %c14_i32 : i32 to vector<1x256xi32>
    %26 = arith.cmpi slt, %5, %25 : vector<1x256xi32>
    %27 = arith.andi %24, %26 : vector<1x256xi1>
    %c2_i32_2 = arith.constant 2 : i32
    %28 = vector.broadcast %c2_i32_2 : i32 to vector<1x256xi32>
    %29 = arith.cmpi sge, %7, %28 : vector<1x256xi32>
    %c18_i32_3 = arith.constant 18 : i32
    %30 = vector.broadcast %c18_i32_3 : i32 to vector<1x256xi32>
    %31 = arith.cmpi slt, %7, %30 : vector<1x256xi32>
    %32 = arith.andi %29, %31 : vector<1x256xi1>
    %c1_i32_4 = arith.constant 1 : i32
    %33 = vector.broadcast %c1_i32_4 : i32 to vector<1x256xi32>
    %34 = arith.cmpi sge, %7, %33 : vector<1x256xi32>
    %c17_i32_5 = arith.constant 17 : i32
    %35 = vector.broadcast %c17_i32_5 : i32 to vector<1x256xi32>
    %36 = arith.cmpi slt, %7, %35 : vector<1x256xi32>
    %37 = arith.andi %34, %36 : vector<1x256xi1>
    %c-1_i32_6 = arith.constant -1 : i32
    %38 = vector.broadcast %c-1_i32_6 : i32 to vector<1x256xi32>
    %39 = arith.cmpi sge, %7, %38 : vector<1x256xi32>
    %c15_i32_7 = arith.constant 15 : i32
    %40 = vector.broadcast %c15_i32_7 : i32 to vector<1x256xi32>
    %41 = arith.cmpi slt, %7, %40 : vector<1x256xi32>
    %42 = arith.andi %39, %41 : vector<1x256xi1>
    %c-2_i32_8 = arith.constant -2 : i32
    %43 = vector.broadcast %c-2_i32_8 : i32 to vector<1x256xi32>
    %44 = arith.cmpi sge, %7, %43 : vector<1x256xi32>
    %c14_i32_9 = arith.constant 14 : i32
    %45 = vector.broadcast %c14_i32_9 : i32 to vector<1x256xi32>
    %46 = arith.cmpi slt, %7, %45 : vector<1x256xi32>
    %47 = arith.andi %44, %46 : vector<1x256xi1>
    %c0_10 = arith.constant 0 : index
    %c0_11 = arith.constant 0 : index
    %48 = vector.load %arg2[%c0_10, %c0_11] : memref<16x4xf32, #tpu.memory_space<vmem>>, vector<16x4xf32>
    %cst = arith.constant dense<0.000000e+00> : vector<16x256xf32>
    %49 = tpu.matmul %48, %0, %cst {dimension_numbers = #tpu.dot_dimension_numbers<[1], [0], [0], [1], [0, 0, 1, 1], [], []>} : vector<16x4xf32>, vector<4x256xf32>, vector<16x256xf32> -> vector<16x256xf32>
    %c0_12 = arith.constant 0 : index
    %c0_13 = arith.constant 0 : index
    %50 = vector.load %arg3[%c0_12, %c0_13] : memref<16x1xf32, #tpu.memory_space<vmem>>, vector<16x1xf32>
    %51 = vector.broadcast %50 : vector<16x1xf32> to vector<16x256xf32>
    %52 = arith.addf %49, %51 : vector<16x256xf32>
    %cst_14 = arith.constant 0.000000e+00 : f32
    %53 = vector.broadcast %cst_14 : f32 to vector<16x256xf32>
    %54 = arith.maximumf %52, %53 : vector<16x256xf32>
    %55 = vector.extract_strided_slice %54 {offsets = [0, 0], sizes = [8, 256], strides = [1, 1]} : vector<16x256xf32> to vector<8x256xf32>
    %56 = vector.extract_strided_slice %54 {offsets = [8, 0], sizes = [8, 256], strides = [1, 1]} : vector<16x256xf32> to vector<8x256xf32>
    %c34_i32 = arith.constant 34 : i32
    %57 = tpu.dynamic_rotate %56 by %c34_i32 dim 1 : vector<8x256xf32>, i32 -> vector<8x256xf32>
    %58 = arith.andi %12, %32 : vector<1x256xi1>
    %cst_15 = arith.constant 0.000000e+00 : f32
    %59 = vector.shape_cast %58 : vector<1x256xi1> to vector<1x256xi1>
    %60 = vector.broadcast %59 : vector<1x256xi1> to vector<8x256xi1>
    %61 = vector.broadcast %cst_15 : f32 to vector<8x256xf32>
    %62 = arith.select %60, %57, %61 : vector<8x256xi1>, vector<8x256xf32>
    %c33_i32 = arith.constant 33 : i32
    %63 = tpu.dynamic_rotate %56 by %c33_i32 dim 1 : vector<8x256xf32>, i32 -> vector<8x256xf32>
    %64 = arith.andi %12, %37 : vector<1x256xi1>
    %cst_16 = arith.constant 0.000000e+00 : f32
    %65 = vector.shape_cast %64 : vector<1x256xi1> to vector<1x256xi1>
    %66 = vector.broadcast %65 : vector<1x256xi1> to vector<8x256xi1>
    %67 = vector.broadcast %cst_16 : f32 to vector<8x256xf32>
    %68 = arith.select %66, %63, %67 : vector<8x256xi1>, vector<8x256xf32>
    %c32_i32 = arith.constant 32 : i32
    %69 = tpu.dynamic_rotate %56 by %c32_i32 dim 1 : vector<8x256xf32>, i32 -> vector<8x256xf32>
    %cst_17 = arith.constant 0.000000e+00 : f32
    %70 = vector.shape_cast %12 : vector<1x256xi1> to vector<1x256xi1>
    %71 = vector.broadcast %70 : vector<1x256xi1> to vector<8x256xi1>
    %72 = vector.broadcast %cst_17 : f32 to vector<8x256xf32>
    %73 = arith.select %71, %69, %72 : vector<8x256xi1>, vector<8x256xf32>
    %c31_i32 = arith.constant 31 : i32
    %74 = tpu.dynamic_rotate %56 by %c31_i32 dim 1 : vector<8x256xf32>, i32 -> vector<8x256xf32>
    %75 = arith.andi %12, %42 : vector<1x256xi1>
    %cst_18 = arith.constant 0.000000e+00 : f32
    %76 = vector.shape_cast %75 : vector<1x256xi1> to vector<1x256xi1>
    %77 = vector.broadcast %76 : vector<1x256xi1> to vector<8x256xi1>
    %78 = vector.broadcast %cst_18 : f32 to vector<8x256xf32>
    %79 = arith.select %77, %74, %78 : vector<8x256xi1>, vector<8x256xf32>
    %c30_i32 = arith.constant 30 : i32
    %80 = tpu.dynamic_rotate %56 by %c30_i32 dim 1 : vector<8x256xf32>, i32 -> vector<8x256xf32>
    %81 = arith.andi %12, %47 : vector<1x256xi1>
    %cst_19 = arith.constant 0.000000e+00 : f32
    %82 = vector.shape_cast %81 : vector<1x256xi1> to vector<1x256xi1>
    %83 = vector.broadcast %82 : vector<1x256xi1> to vector<8x256xi1>
    %84 = vector.broadcast %cst_19 : f32 to vector<8x256xf32>
    %85 = arith.select %83, %80, %84 : vector<8x256xi1>, vector<8x256xf32>
    %c18_i32_20 = arith.constant 18 : i32
    %86 = tpu.dynamic_rotate %56 by %c18_i32_20 dim 1 : vector<8x256xf32>, i32 -> vector<8x256xf32>
    %87 = arith.andi %17, %32 : vector<1x256xi1>
    %cst_21 = arith.constant 0.000000e+00 : f32
    %88 = vector.shape_cast %87 : vector<1x256xi1> to vector<1x256xi1>
    %89 = vector.broadcast %88 : vector<1x256xi1> to vector<8x256xi1>
    %90 = vector.broadcast %cst_21 : f32 to vector<8x256xf32>
    %91 = arith.select %89, %86, %90 : vector<8x256xi1>, vector<8x256xf32>
    %c17_i32_22 = arith.constant 17 : i32
    %92 = tpu.dynamic_rotate %56 by %c17_i32_22 dim 1 : vector<8x256xf32>, i32 -> vector<8x256xf32>
    %93 = arith.andi %17, %37 : vector<1x256xi1>
    %cst_23 = arith.constant 0.000000e+00 : f32
    %94 = vector.shape_cast %93 : vector<1x256xi1> to vector<1x256xi1>
    %95 = vector.broadcast %94 : vector<1x256xi1> to vector<8x256xi1>
    %96 = vector.broadcast %cst_23 : f32 to vector<8x256xf32>
    %97 = arith.select %95, %92, %96 : vector<8x256xi1>, vector<8x256xf32>
    %c16_i32 = arith.constant 16 : i32
    %98 = tpu.dynamic_rotate %56 by %c16_i32 dim 1 : vector<8x256xf32>, i32 -> vector<8x256xf32>
    %cst_24 = arith.constant 0.000000e+00 : f32
    %99 = vector.shape_cast %17 : vector<1x256xi1> to vector<1x256xi1>
    %100 = vector.broadcast %99 : vector<1x256xi1> to vector<8x256xi1>
    %101 = vector.broadcast %cst_24 : f32 to vector<8x256xf32>
    %102 = arith.select %100, %98, %101 : vector<8x256xi1>, vector<8x256xf32>
    %c15_i32_25 = arith.constant 15 : i32
    %103 = tpu.dynamic_rotate %56 by %c15_i32_25 dim 1 : vector<8x256xf32>, i32 -> vector<8x256xf32>
    %104 = arith.andi %17, %42 : vector<1x256xi1>
    %cst_26 = arith.constant 0.000000e+00 : f32
    %105 = vector.shape_cast %104 : vector<1x256xi1> to vector<1x256xi1>
    %106 = vector.broadcast %105 : vector<1x256xi1> to vector<8x256xi1>
    %107 = vector.broadcast %cst_26 : f32 to vector<8x256xf32>
    %108 = arith.select %106, %103, %107 : vector<8x256xi1>, vector<8x256xf32>
    %c14_i32_27 = arith.constant 14 : i32
    %109 = tpu.dynamic_rotate %56 by %c14_i32_27 dim 1 : vector<8x256xf32>, i32 -> vector<8x256xf32>
    %110 = arith.andi %17, %47 : vector<1x256xi1>
    %cst_28 = arith.constant 0.000000e+00 : f32
    %111 = vector.shape_cast %110 : vector<1x256xi1> to vector<1x256xi1>
    %112 = vector.broadcast %111 : vector<1x256xi1> to vector<8x256xi1>
    %113 = vector.broadcast %cst_28 : f32 to vector<8x256xf32>
    %114 = arith.select %112, %109, %113 : vector<8x256xi1>, vector<8x256xf32>
    %c2_i32_29 = arith.constant 2 : i32
    %115 = tpu.dynamic_rotate %56 by %c2_i32_29 dim 1 : vector<8x256xf32>, i32 -> vector<8x256xf32>
    %cst_30 = arith.constant 0.000000e+00 : f32
    %116 = vector.shape_cast %32 : vector<1x256xi1> to vector<1x256xi1>
    %117 = vector.broadcast %116 : vector<1x256xi1> to vector<8x256xi1>
    %118 = vector.broadcast %cst_30 : f32 to vector<8x256xf32>
    %119 = arith.select %117, %115, %118 : vector<8x256xi1>, vector<8x256xf32>
    %c1_i32_31 = arith.constant 1 : i32
    %120 = tpu.dynamic_rotate %56 by %c1_i32_31 dim 1 : vector<8x256xf32>, i32 -> vector<8x256xf32>
    %cst_32 = arith.constant 0.000000e+00 : f32
    %121 = vector.shape_cast %37 : vector<1x256xi1> to vector<1x256xi1>
    %122 = vector.broadcast %121 : vector<1x256xi1> to vector<8x256xi1>
    %123 = vector.broadcast %cst_32 : f32 to vector<8x256xf32>
    %124 = arith.select %122, %120, %123 : vector<8x256xi1>, vector<8x256xf32>
    %c255_i32_33 = arith.constant 255 : i32
    %125 = tpu.dynamic_rotate %56 by %c255_i32_33 dim 1 : vector<8x256xf32>, i32 -> vector<8x256xf32>
    %cst_34 = arith.constant 0.000000e+00 : f32
    %126 = vector.shape_cast %42 : vector<1x256xi1> to vector<1x256xi1>
    %127 = vector.broadcast %126 : vector<1x256xi1> to vector<8x256xi1>
    %128 = vector.broadcast %cst_34 : f32 to vector<8x256xf32>
    %129 = arith.select %127, %125, %128 : vector<8x256xi1>, vector<8x256xf32>
    %c254_i32 = arith.constant 254 : i32
    %130 = tpu.dynamic_rotate %56 by %c254_i32 dim 1 : vector<8x256xf32>, i32 -> vector<8x256xf32>
    %cst_35 = arith.constant 0.000000e+00 : f32
    %131 = vector.shape_cast %47 : vector<1x256xi1> to vector<1x256xi1>
    %132 = vector.broadcast %131 : vector<1x256xi1> to vector<8x256xi1>
    %133 = vector.broadcast %cst_35 : f32 to vector<8x256xf32>
    %134 = arith.select %132, %130, %133 : vector<8x256xi1>, vector<8x256xf32>
    %c242_i32 = arith.constant 242 : i32
    %135 = tpu.dynamic_rotate %56 by %c242_i32 dim 1 : vector<8x256xf32>, i32 -> vector<8x256xf32>
    %136 = arith.andi %22, %32 : vector<1x256xi1>
    %cst_36 = arith.constant 0.000000e+00 : f32
    %137 = vector.shape_cast %136 : vector<1x256xi1> to vector<1x256xi1>
    %138 = vector.broadcast %137 : vector<1x256xi1> to vector<8x256xi1>
    %139 = vector.broadcast %cst_36 : f32 to vector<8x256xf32>
    %140 = arith.select %138, %135, %139 : vector<8x256xi1>, vector<8x256xf32>
    %c241_i32 = arith.constant 241 : i32
    %141 = tpu.dynamic_rotate %56 by %c241_i32 dim 1 : vector<8x256xf32>, i32 -> vector<8x256xf32>
    %142 = arith.andi %22, %37 : vector<1x256xi1>
    %cst_37 = arith.constant 0.000000e+00 : f32
    %143 = vector.shape_cast %142 : vector<1x256xi1> to vector<1x256xi1>
    %144 = vector.broadcast %143 : vector<1x256xi1> to vector<8x256xi1>
    %145 = vector.broadcast %cst_37 : f32 to vector<8x256xf32>
    %146 = arith.select %144, %141, %145 : vector<8x256xi1>, vector<8x256xf32>
    %c240_i32 = arith.constant 240 : i32
    %147 = tpu.dynamic_rotate %56 by %c240_i32 dim 1 : vector<8x256xf32>, i32 -> vector<8x256xf32>
    %cst_38 = arith.constant 0.000000e+00 : f32
    %148 = vector.shape_cast %22 : vector<1x256xi1> to vector<1x256xi1>
    %149 = vector.broadcast %148 : vector<1x256xi1> to vector<8x256xi1>
    %150 = vector.broadcast %cst_38 : f32 to vector<8x256xf32>
    %151 = arith.select %149, %147, %150 : vector<8x256xi1>, vector<8x256xf32>
    %c239_i32 = arith.constant 239 : i32
    %152 = tpu.dynamic_rotate %56 by %c239_i32 dim 1 : vector<8x256xf32>, i32 -> vector<8x256xf32>
    %153 = arith.andi %22, %42 : vector<1x256xi1>
    %cst_39 = arith.constant 0.000000e+00 : f32
    %154 = vector.shape_cast %153 : vector<1x256xi1> to vector<1x256xi1>
    %155 = vector.broadcast %154 : vector<1x256xi1> to vector<8x256xi1>
    %156 = vector.broadcast %cst_39 : f32 to vector<8x256xf32>
    %157 = arith.select %155, %152, %156 : vector<8x256xi1>, vector<8x256xf32>
    %c238_i32 = arith.constant 238 : i32
    %158 = tpu.dynamic_rotate %56 by %c238_i32 dim 1 : vector<8x256xf32>, i32 -> vector<8x256xf32>
    %159 = arith.andi %22, %47 : vector<1x256xi1>
    %cst_40 = arith.constant 0.000000e+00 : f32
    %160 = vector.shape_cast %159 : vector<1x256xi1> to vector<1x256xi1>
    %161 = vector.broadcast %160 : vector<1x256xi1> to vector<8x256xi1>
    %162 = vector.broadcast %cst_40 : f32 to vector<8x256xf32>
    %163 = arith.select %161, %158, %162 : vector<8x256xi1>, vector<8x256xf32>
    %c226_i32 = arith.constant 226 : i32
    %164 = tpu.dynamic_rotate %56 by %c226_i32 dim 1 : vector<8x256xf32>, i32 -> vector<8x256xf32>
    %165 = arith.andi %27, %32 : vector<1x256xi1>
    %cst_41 = arith.constant 0.000000e+00 : f32
    %166 = vector.shape_cast %165 : vector<1x256xi1> to vector<1x256xi1>
    %167 = vector.broadcast %166 : vector<1x256xi1> to vector<8x256xi1>
    %168 = vector.broadcast %cst_41 : f32 to vector<8x256xf32>
    %169 = arith.select %167, %164, %168 : vector<8x256xi1>, vector<8x256xf32>
    %c225_i32 = arith.constant 225 : i32
    %170 = tpu.dynamic_rotate %56 by %c225_i32 dim 1 : vector<8x256xf32>, i32 -> vector<8x256xf32>
    %171 = arith.andi %27, %37 : vector<1x256xi1>
    %cst_42 = arith.constant 0.000000e+00 : f32
    %172 = vector.shape_cast %171 : vector<1x256xi1> to vector<1x256xi1>
    %173 = vector.broadcast %172 : vector<1x256xi1> to vector<8x256xi1>
    %174 = vector.broadcast %cst_42 : f32 to vector<8x256xf32>
    %175 = arith.select %173, %170, %174 : vector<8x256xi1>, vector<8x256xf32>
    %c224_i32 = arith.constant 224 : i32
    %176 = tpu.dynamic_rotate %56 by %c224_i32 dim 1 : vector<8x256xf32>, i32 -> vector<8x256xf32>
    %cst_43 = arith.constant 0.000000e+00 : f32
    %177 = vector.shape_cast %27 : vector<1x256xi1> to vector<1x256xi1>
    %178 = vector.broadcast %177 : vector<1x256xi1> to vector<8x256xi1>
    %179 = vector.broadcast %cst_43 : f32 to vector<8x256xf32>
    %180 = arith.select %178, %176, %179 : vector<8x256xi1>, vector<8x256xf32>
    %c223_i32 = arith.constant 223 : i32
    %181 = tpu.dynamic_rotate %56 by %c223_i32 dim 1 : vector<8x256xf32>, i32 -> vector<8x256xf32>
    %182 = arith.andi %27, %42 : vector<1x256xi1>
    %cst_44 = arith.constant 0.000000e+00 : f32
    %183 = vector.shape_cast %182 : vector<1x256xi1> to vector<1x256xi1>
    %184 = vector.broadcast %183 : vector<1x256xi1> to vector<8x256xi1>
    %185 = vector.broadcast %cst_44 : f32 to vector<8x256xf32>
    %186 = arith.select %184, %181, %185 : vector<8x256xi1>, vector<8x256xf32>
    %c222_i32 = arith.constant 222 : i32
    %187 = tpu.dynamic_rotate %56 by %c222_i32 dim 1 : vector<8x256xf32>, i32 -> vector<8x256xf32>
    %188 = arith.andi %27, %47 : vector<1x256xi1>
    %cst_45 = arith.constant 0.000000e+00 : f32
    %189 = vector.shape_cast %188 : vector<1x256xi1> to vector<1x256xi1>
    %190 = vector.broadcast %189 : vector<1x256xi1> to vector<8x256xi1>
    %191 = vector.broadcast %cst_45 : f32 to vector<8x256xf32>
    %192 = arith.select %190, %187, %191 : vector<8x256xi1>, vector<8x256xf32>
    %193 = tpu.concatenate %62, %68, %73, %79, %85, %91, %97, %102, %108, %114, %119, %124, %56, %129, %134, %140 in 0 : vector<8x256xf32>, vector<8x256xf32>, vector<8x256xf32>, vector<8x256xf32>, vector<8x256xf32>, vector<8x256xf32>, vector<8x256xf32>, vector<8x256xf32>, vector<8x256xf32>, vector<8x256xf32>, vector<8x256xf32>, vector<8x256xf32>, vector<8x256xf32>, vector<8x256xf32>, vector<8x256xf32>, vector<8x256xf32> -> vector<128x256xf32>
    %194 = tpu.concatenate %146, %151, %157, %163, %169, %175, %180, %186, %192 in 0 : vector<8x256xf32>, vector<8x256xf32>, vector<8x256xf32>, vector<8x256xf32>, vector<8x256xf32>, vector<8x256xf32>, vector<8x256xf32>, vector<8x256xf32>, vector<8x256xf32> -> vector<72x256xf32>
    %195 = tpu.concatenate %193, %194 in 0 : vector<128x256xf32>, vector<72x256xf32> -> vector<200x256xf32>
    %c0_46 = arith.constant 0 : index
    %c0_47 = arith.constant 0 : index
    %196 = vector.load %arg4[%c0_46, %c0_47] : memref<16x200xf32, #tpu.memory_space<vmem>>, vector<16x200xf32>
    %cst_48 = arith.constant dense<0.000000e+00> : vector<16x256xf32>
    %197 = tpu.matmul %196, %195, %cst_48 {dimension_numbers = #tpu.dot_dimension_numbers<[1], [0], [0], [1], [0, 0, 1, 1], [], []>} : vector<16x200xf32>, vector<200x256xf32>, vector<16x256xf32> -> vector<16x256xf32>
    %c0_49 = arith.constant 0 : index
    %c0_50 = arith.constant 0 : index
    %198 = vector.load %arg5[%c0_49, %c0_50] : memref<16x1xf32, #tpu.memory_space<vmem>>, vector<16x1xf32>
    %199 = vector.broadcast %198 : vector<16x1xf32> to vector<16x256xf32>
    %200 = arith.addf %197, %199 : vector<16x256xf32>
    %cst_51 = arith.constant 0.000000e+00 : f32
    %201 = vector.broadcast %cst_51 : f32 to vector<16x256xf32>
    %202 = arith.maximumf %200, %201 : vector<16x256xf32>
    %c17_i32_52 = arith.constant 17 : i32
    %203 = tpu.dynamic_rotate %0 by %c17_i32_52 dim 1 : vector<4x256xf32>, i32 -> vector<4x256xf32>
    %cst_53 = arith.constant -3.000000e+38 : f32
    %204 = vector.shape_cast %93 : vector<1x256xi1> to vector<1x256xi1>
    %205 = vector.broadcast %204 : vector<1x256xi1> to vector<4x256xi1>
    %206 = vector.broadcast %cst_53 : f32 to vector<4x256xf32>
    %207 = arith.select %205, %203, %206 : vector<4x256xi1>, vector<4x256xf32>
    %208 = arith.maximumf %0, %207 : vector<4x256xf32>
    %c16_i32_54 = arith.constant 16 : i32
    %209 = tpu.dynamic_rotate %0 by %c16_i32_54 dim 1 : vector<4x256xf32>, i32 -> vector<4x256xf32>
    %cst_55 = arith.constant -3.000000e+38 : f32
    %210 = vector.shape_cast %17 : vector<1x256xi1> to vector<1x256xi1>
    %211 = vector.broadcast %210 : vector<1x256xi1> to vector<4x256xi1>
    %212 = vector.broadcast %cst_55 : f32 to vector<4x256xf32>
    %213 = arith.select %211, %209, %212 : vector<4x256xi1>, vector<4x256xf32>
    %214 = arith.maximumf %208, %213 : vector<4x256xf32>
    %c15_i32_56 = arith.constant 15 : i32
    %215 = tpu.dynamic_rotate %0 by %c15_i32_56 dim 1 : vector<4x256xf32>, i32 -> vector<4x256xf32>
    %cst_57 = arith.constant -3.000000e+38 : f32
    %216 = vector.shape_cast %104 : vector<1x256xi1> to vector<1x256xi1>
    %217 = vector.broadcast %216 : vector<1x256xi1> to vector<4x256xi1>
    %218 = vector.broadcast %cst_57 : f32 to vector<4x256xf32>
    %219 = arith.select %217, %215, %218 : vector<4x256xi1>, vector<4x256xf32>
    %220 = arith.maximumf %214, %219 : vector<4x256xf32>
    %c1_i32_58 = arith.constant 1 : i32
    %221 = tpu.dynamic_rotate %0 by %c1_i32_58 dim 1 : vector<4x256xf32>, i32 -> vector<4x256xf32>
    %cst_59 = arith.constant -3.000000e+38 : f32
    %222 = vector.shape_cast %37 : vector<1x256xi1> to vector<1x256xi1>
    %223 = vector.broadcast %222 : vector<1x256xi1> to vector<4x256xi1>
    %224 = vector.broadcast %cst_59 : f32 to vector<4x256xf32>
    %225 = arith.select %223, %221, %224 : vector<4x256xi1>, vector<4x256xf32>
    %226 = arith.maximumf %220, %225 : vector<4x256xf32>
    %c255_i32_60 = arith.constant 255 : i32
    %227 = tpu.dynamic_rotate %0 by %c255_i32_60 dim 1 : vector<4x256xf32>, i32 -> vector<4x256xf32>
    %cst_61 = arith.constant -3.000000e+38 : f32
    %228 = vector.shape_cast %42 : vector<1x256xi1> to vector<1x256xi1>
    %229 = vector.broadcast %228 : vector<1x256xi1> to vector<4x256xi1>
    %230 = vector.broadcast %cst_61 : f32 to vector<4x256xf32>
    %231 = arith.select %229, %227, %230 : vector<4x256xi1>, vector<4x256xf32>
    %232 = arith.maximumf %226, %231 : vector<4x256xf32>
    %c241_i32_62 = arith.constant 241 : i32
    %233 = tpu.dynamic_rotate %0 by %c241_i32_62 dim 1 : vector<4x256xf32>, i32 -> vector<4x256xf32>
    %cst_63 = arith.constant -3.000000e+38 : f32
    %234 = vector.shape_cast %142 : vector<1x256xi1> to vector<1x256xi1>
    %235 = vector.broadcast %234 : vector<1x256xi1> to vector<4x256xi1>
    %236 = vector.broadcast %cst_63 : f32 to vector<4x256xf32>
    %237 = arith.select %235, %233, %236 : vector<4x256xi1>, vector<4x256xf32>
    %238 = arith.maximumf %232, %237 : vector<4x256xf32>
    %c240_i32_64 = arith.constant 240 : i32
    %239 = tpu.dynamic_rotate %0 by %c240_i32_64 dim 1 : vector<4x256xf32>, i32 -> vector<4x256xf32>
    %cst_65 = arith.constant -3.000000e+38 : f32
    %240 = vector.shape_cast %22 : vector<1x256xi1> to vector<1x256xi1>
    %241 = vector.broadcast %240 : vector<1x256xi1> to vector<4x256xi1>
    %242 = vector.broadcast %cst_65 : f32 to vector<4x256xf32>
    %243 = arith.select %241, %239, %242 : vector<4x256xi1>, vector<4x256xf32>
    %244 = arith.maximumf %238, %243 : vector<4x256xf32>
    %c239_i32_66 = arith.constant 239 : i32
    %245 = tpu.dynamic_rotate %0 by %c239_i32_66 dim 1 : vector<4x256xf32>, i32 -> vector<4x256xf32>
    %cst_67 = arith.constant -3.000000e+38 : f32
    %246 = vector.shape_cast %153 : vector<1x256xi1> to vector<1x256xi1>
    %247 = vector.broadcast %246 : vector<1x256xi1> to vector<4x256xi1>
    %248 = vector.broadcast %cst_67 : f32 to vector<4x256xf32>
    %249 = arith.select %247, %245, %248 : vector<4x256xi1>, vector<4x256xf32>
    %250 = arith.maximumf %244, %249 : vector<4x256xf32>
    %c0_68 = arith.constant 0 : index
    %c0_69 = arith.constant 0 : index
    %251 = vector.load %arg6[%c0_68, %c0_69] : memref<8x4xf32, #tpu.memory_space<vmem>>, vector<8x4xf32>
    %cst_70 = arith.constant dense<0.000000e+00> : vector<8x256xf32>
    %252 = tpu.matmul %251, %250, %cst_70 {dimension_numbers = #tpu.dot_dimension_numbers<[1], [0], [0], [1], [0, 0, 1, 1], [], []>} : vector<8x4xf32>, vector<4x256xf32>, vector<8x256xf32> -> vector<8x256xf32>
    %c0_71 = arith.constant 0 : index
    %c0_72 = arith.constant 0 : index
    %253 = vector.load %arg7[%c0_71, %c0_72] : memref<8x1xf32, #tpu.memory_space<vmem>>, vector<8x1xf32>
    %254 = vector.broadcast %253 : vector<8x1xf32> to vector<8x256xf32>
    %255 = arith.addf %252, %254 : vector<8x256xf32>
    %cst_73 = arith.constant 0.000000e+00 : f32
    %256 = vector.broadcast %cst_73 : f32 to vector<8x256xf32>
    %257 = arith.maximumf %255, %256 : vector<8x256xf32>
    %c0_74 = arith.constant 0 : index
    %c0_75 = arith.constant 0 : index
    %258 = vector.load %arg8[%c0_74, %c0_75] : memref<32x256xf32, #tpu.memory_space<vmem>>, vector<8x256xf32>
    tpu.vector_store %arg8[%c0_74, %c0_75], %55 {strides = array<i32>} : memref<32x256xf32, #tpu.memory_space<vmem>>, vector<8x256xf32>,
    %c8 = arith.constant 8 : index
    %c0_76 = arith.constant 0 : index
    %259 = vector.load %arg8[%c8, %c0_76] : memref<32x256xf32, #tpu.memory_space<vmem>>, vector<16x256xf32>
    tpu.vector_store %arg8[%c8, %c0_76], %202 {strides = array<i32>} : memref<32x256xf32, #tpu.memory_space<vmem>>, vector<16x256xf32>,
    %c24 = arith.constant 24 : index
    %c0_77 = arith.constant 0 : index
    %260 = vector.load %arg8[%c24, %c0_77] : memref<32x256xf32, #tpu.memory_space<vmem>>, vector<8x256xf32>
    tpu.vector_store %arg8[%c24, %c0_77], %257 {strides = array<i32>} : memref<32x256xf32, #tpu.memory_space<vmem>>, vector<8x256xf32>,
    return
  }
  func.func @transform_0(%arg0: i32) -> (i32, i32) {
    %c0_i32 = arith.constant 0 : i32
    %c0_i32_0 = arith.constant 0 : i32
    return %c0_i32, %arg0 : i32, i32
  }
  func.func @transform_1(%arg0: i32) -> (i32, i32) {
    %c0_i32 = arith.constant 0 : i32
    %c0_i32_0 = arith.constant 0 : i32
    %c0_i32_1 = arith.constant 0 : i32
    return %c0_i32, %c0_i32_0 : i32, i32
  }
  func.func @transform_2(%arg0: i32) -> (i32, i32) {
    %c0_i32 = arith.constant 0 : i32
    %c0_i32_0 = arith.constant 0 : i32
    %c0_i32_1 = arith.constant 0 : i32
    return %c0_i32, %c0_i32_0 : i32, i32
  }
  func.func @transform_3(%arg0: i32) -> (i32, i32) {
    %c0_i32 = arith.constant 0 : i32
    %c0_i32_0 = arith.constant 0 : i32
    %c0_i32_1 = arith.constant 0 : i32
    return %c0_i32, %c0_i32_0 : i32, i32
  }
  func.func @transform_4(%arg0: i32) -> (i32, i32) {
    %c0_i32 = arith.constant 0 : i32
    %c0_i32_0 = arith.constant 0 : i32
    %c0_i32_1 = arith.constant 0 : i32
    return %c0_i32, %c0_i32_0 : i32, i32
  }
  func.func @transform_5(%arg0: i32) -> (i32, i32) {
    %c0_i32 = arith.constant 0 : i32
    %c0_i32_0 = arith.constant 0 : i32
    %c0_i32_1 = arith.constant 0 : i32
    return %c0_i32, %c0_i32_0 : i32, i32
  }
  func.func @transform_6(%arg0: i32) -> (i32, i32) {
    %c0_i32 = arith.constant 0 : i32
    %c0_i32_0 = arith.constant 0 : i32
    %c0_i32_1 = arith.constant 0 : i32
    return %c0_i32, %c0_i32_0 : i32, i32
  }
  func.func @transform_7(%arg0: i32) -> (i32, i32) {
    %c0_i32 = arith.constant 0 : i32
    %c0_i32_0 = arith.constant 0 : i32
    return %c0_i32, %arg0 : i32, i32
  }
}

</mosaic_0001>

<bundles_post_ra>
// kernel: inception_forward.1
= control target key start
LH: loop header
LB: loop body
LE: loop exit
PB: predicated region body
PF: predicated region fallthrough
CT: control target
= control target key end

     0   :  { %s1405_s24 = smov 0   ;;  %s1407_s25 = smov 0   ;;  %s2234_s0 = inlined_call_operand.vmem [shape: f32[4,512], index: 0, kind: input, shape index: {}]   ;;  %s2235_s1 = inlined_call_operand.vmem [shape: f32[16,4], index: 1, kind: input, shape index: {}]   ;;  %s2236_s2 = inlined_call_operand.vmem [shape: f32[16,1], index: 2, kind: input, shape index: {}]   ;;  %s2237_s3 = inlined_call_operand.vmem [shape: f32[16,200], index: 3, kind: input, shape index: {}]   ;;  %s2238_s4 = inlined_call_operand.vmem [shape: f32[16,1], index: 4, kind: input, shape index: {}]   ;;  %s2239_s5 = inlined_call_operand.vmem [shape: f32[8,4], index: 5, kind: input, shape index: {}]   ;;  %s2240_s6 = inlined_call_operand.vmem [shape: f32[8,1], index: 6, kind: input, shape index: {}]   ;;  %s2241_s7 = inlined_call_operand.vmem [shape: f32[32,512], index: 7, kind: output, shape index: {}]  }
   0x1   :  { %s1409_s26 = smov 0  }
   0x2 LB: > { %s1418_s27 = sadd.s32 4294967295, %s1338_s26   ;;  %s1420_s28 = sadd.s32 1, %s1338_s26   ;;  %s1338_s26 = sphi %s1409_s26, %s2378_s26   ;;  %s1334_s25 = sphi %s1407_s25, %s2377_s25   ;;  %s1330_s24 = sphi %s1405_s24, %s2376_s24  }
   0x3   : > { %s173_s29 = ssub.s32 %s1338_s26, %s1420_s28  ;;  %s176_s30 = sadd.s32 1, %s1334_s25 }
   0x4   : > { %p174_p0 = scmp.eq.s32.totalorder %s173_s29, 0  ;;  %p186_p1 = scmp.ne.s32.totalorder %s1334_s25, %s1330_s24 }
   0x5   : > { %p187_p2 = scmp.eq.s32.totalorder %s1418_s27, 1  ;;  %p1192_p3 = scmp.ge.s32.totalorder %s1338_s26, 1 }
   0x6   : > { %s1428_s8 = scalar_select %p174_p0, %s1334_s25, %s176_s30  }
   0x7   : > { %p1430_p4 = por %p187_p2, %p186_p1  ;;  %p238_p5 = scmp.lt.s32.totalorder %s1338_s26, 3 }
   0x9   : > { %p239_p6 = pnand %p1192_p3, %p238_p5 }
   0xa   : > { %s1194_s10 = sshll.u32 (!%p239_p6), %s1418_s27, 1  ;;  %s1341_s21 = smov (!%p239_p6), 17  }
   0xb   : > { %242 = sbr.rel (%p239_p6) target bundleno = 599 (0x257), region = 48  ;;  %p270_p7 = scmp.lt.s32.totalorder (!%p239_p6), %s1194_s10, 3 }
   0xc   : > { %s1342_s22 = smov (!%p239_p6), 16   ;;  %s1343_s23 = smov (!%p239_p6), 15  }
   0xd   : > { %s1344_s26 = smov (!%p239_p6), 1   ;;  %s1345_s29 = smov (!%p239_p6), 127  }
   0xe   : > { %s1346_s30 = smov (!%p239_p6), 113   ;;  %s1348_s11 = smov (!%p239_p6), 126  }
   0xf   : > { %s1349_s12 = smov (!%p239_p6), 114   ;;  %s1351_s14 = smov (!%p239_p6), 94  }
  0x10   : > { %v1340_v0 = vmov 0   ;;  %v337_v1 = vld [vmem:[%s2236_s2 + $0x8] sm:$0xff]  ;;  %s2380_s10 = smov (!%p270_p7, %s1194_s10), 3  ;;  %vm2252_vm0 = vcmask 1043456   ;;  %v334_v3 = vld [vmem:[%s2235_s1] sm:$0xff]  ;;  %vm2242_vm1 = vcmask 31744   ;;  %v277_v32 = vlaneseq }
  0x11   : > { %1313 = vset.pattern.permute.xlu0 %v1340_v0  ;;  %1315 = vset.pattern.permute.xlu1 %v1340_v0  ;;  %s1195_s13 = sshll.u32 %s2380_s10, 2  ;;  %v335_v6 = vld [vmem:[%s2235_s1 + $0x8] sm:$0xff]  ;;  %s1347_s10 = smov 112   ;;  %v2272_v47 = vmov 0  ;;  %v2276_v52 = vmov 0  ;;  %v2278_v63 = vmov 0 }
  0x12   : > { %345 = vperm.xlu0 %1313, %v337_v1   ;;  %1314 = vset.pattern.permute.xlu2 %v1340_v0  ;;  %s273_s16 = scalar_lea.vmem %s2234_s0, %s1195_s13  ;;  %s1350_s13 = smov 2   ;;  %v1510_v34 = vand.u32 127, %v277_v32  ;;  %v1029_v50 = vld [vmem:[%s2239_s5] sm:$0xff] }
  0x13   : > { %v1441_v2 = vld [vmem:[%s273_s16] sm:$0xff]  ;;  %s1352_s15 = smov 96   ;;  %s1353_s16 = smov 95  }
  0x14   : > { %349 = vst [vmem:[#allocation1] ss:$2 sm:$0xff] %v1441_v2  ;;  %s1354_s17 = smov 14   ;;  %s1355_s18 = smov 97   ;;  %v279_v35 = vadd.s32 128, %v1510_v34  ;;  %v280_v36 = vand.u32 255, %v1510_v34 }
  0x15   : > { %vm2243_vm2 = vcmp.lt.s32.totalorder %v1510_v34, 17  ;;  %s1356_s19 = smov 98   ;;  %vm2244_vm7 = vcmp.lt.s32.totalorder %v1510_v34, 16  ;;  %s1357_s20 = smov 110  }
  0x16   : > { %v281_v39 = vand.u32 255, %v279_v35  ;;  %v1519_v40 = vshra.s32 %v280_v36, 4  ;;  %v1521_v41 = vand.u32 15, %v280_v36 }
  0x18   : > { %v1529_v42 = vshra.s32 %v281_v39, 4  ;;  %v1531_v43 = vand.u32 15, %v281_v39  ;;  %vm292_vm3 = vcmp.ge.s32.totalorder %v1519_v40, 1  ;;  %vm294_vm4 = vcmp.lt.s32.totalorder %v1519_v40, 17 }
  0x19   : > { %vm1535_vm5 = vmand %vm292_vm3, %vm294_vm4  ;;  %vm2254_vm6 = vcmp.ge.s32.totalorder %v1521_v41, 1  ;;  %vm2248_vm14 = vcmp.lt.s32.totalorder %v1521_v41, 15  ;;  %vm2245_vm3 = vcmp.lt.s32.totalorder %v1510_v34, 15  ;;  %v2284_v39 = vmov 0 }
  0x1a   : > { %vm293_vm8 = vcmp.ge.s32.totalorder %v1529_v42, 1  ;;  %vm295_vm9 = vcmp.lt.s32.totalorder %v1529_v42, 17  ;;  %vm2253_vm10 = vcmp.ge.s32.totalorder %v1531_v43, 1  ;;  %vm1548_vm11 = vmand %vm1535_vm5, %vm2254_vm6  ;;  %vm2247_vm15 = vcmp.lt.s32.totalorder %v1531_v43, 15 }
  0x1b   : > { %v350_v4 = vld.sshfl [vmem:[#allocation1] sm:$0xff pattern:$0x75316420]  ;;  %v351_v5 = vld.sshfl [vmem:[#allocation1 + $0x8] sm:$0xff pattern:$0x75316420]  ;;  %vm1554_vm12 = vmand %vm293_vm8, %vm295_vm9 }
  0x1c   : > { %1196 = vmatpush.msk.msra.mxu3 %vm2252_vm0, %v350_v4  ;;  %1199 = vmatpush.msk.msra.mxu1 %vm2252_vm0, %v351_v5  ;;  %877 = vst [vmem:[#allocation1] ss:$2 sm:$0xff] %v1441_v2  ;;  %v2273_v47 = vsel %vm1548_vm11, 4294967295, %v2272_v47  ;;  %vm1564_vm13 = vmand %vm1554_vm12, %vm2253_vm10  ;;  %vm2246_vm9 = vcmp.lt.s32.totalorder %v1510_v34, 1 }
  0x1d   : > { %1197 = vmatmul.msk.f32.vlgmr.msra.gmra.mxu3 %vm2242_vm1, %v334_v3  ;;  %1200 = vmatmul.msk.f32.vlgmr.msra.gmra.mxu1 %vm2242_vm1, %v334_v3  ;;  %v2277_v52 = vsel %vm1564_vm13, 4294967295, %v2276_v52  ;;  %vm1591_vm4 = vmand %vm1535_vm5, %vm2248_vm14 }
  0x1e   : > { %v2279_v63 = vsel %vm1591_vm4, 4294967295, %v2278_v63  ;;  %vm1603_vm8 = vmand %vm1554_vm12, %vm2247_vm15 }
  0x23   : > { %v879_v7 = vld.sshfl [vmem:[#allocation1 + $0x8] sm:$0xff pattern:$0x75316420]  ;;  %v878_v8 = vld.sshfl [vmem:[#allocation1] sm:$0xff pattern:$0x75316420] }
  0x24   : > { %884 = vrot.lane.b32.xlu2 %v879_v7, %s1341_s21  ;;  %882 = vrot.lane.b32.xlu1 %v878_v8, %s1341_s21  ;;  %896 = vst [vmem:[#allocation1] ss:$2 sm:$0xff] %v1441_v2 }
  0x25   : > { %1198 = vmatmul.msk.f32.gmra.mxu3 %vm2242_vm1, %v335_v6  ;;  %1201 = vmatmul.msk.f32.gmra.mxu1 %vm2242_vm1, %v335_v6  ;;  %vm2250_vm1 = vcmp.lt.s32.totalorder %v1510_v34, 127 }
  0x2b   : > { %v898_v9 = vld.sshfl [vmem:[#allocation1 + $0x8] sm:$0xff pattern:$0x75316420]  ;;  %v897_v10 = vld.sshfl [vmem:[#allocation1] sm:$0xff pattern:$0x75316420] }
  0x2c   : > { %903 = vrot.lane.b32.xlu2 %v898_v9, %s1342_s22  ;;  %901 = vrot.lane.b32.xlu1 %v897_v10, %s1342_s22  ;;  %915 = vst [vmem:[#allocation1] ss:$2 sm:$0xff] %v1441_v2 }
  0x33   : > { %v917_v11 = vld.sshfl [vmem:[#allocation1 + $0x8] sm:$0xff pattern:$0x75316420]  ;;  %v916_v12 = vld.sshfl [vmem:[#allocation1] sm:$0xff pattern:$0x75316420] }
  0x34   : > { %922 = vrot.lane.b32.xlu2 %v917_v11, %s1343_s23  ;;  %920 = vrot.lane.b32.xlu1 %v916_v12, %s1343_s23  ;;  %934 = vst [vmem:[#allocation1] ss:$2 sm:$0xff] %v1441_v2 }
  0x3b   : > { %v936_v13 = vld.sshfl [vmem:[#allocation1 + $0x8] sm:$0xff pattern:$0x75316420]  ;;  %v935_v14 = vld.sshfl [vmem:[#allocation1] sm:$0xff pattern:$0x75316420] }
  0x3c   : > { %941 = vrot.lane.b32.xlu2 %v936_v13, %s1344_s26  ;;  %939 = vrot.lane.b32.xlu1 %v935_v14, %s1344_s26  ;;  %953 = vst [vmem:[#allocation1] ss:$2 sm:$0xff] %v1441_v2 }
  0x43   : > { %v955_v15 = vld.sshfl [vmem:[#allocation1 + $0x8] sm:$0xff pattern:$0x75316420]  ;;  %v954_v16 = vld.sshfl [vmem:[#allocation1] sm:$0xff pattern:$0x75316420] }
  0x44   : > { %960 = vrot.lane.b32.xlu2 %v955_v15, %s1345_s29  ;;  %958 = vrot.lane.b32.xlu1 %v954_v16, %s1345_s29  ;;  %972 = vst [vmem:[#allocation1] ss:$2 sm:$0xff] %v1441_v2 }
  0x4b   : > { %v974_v17 = vld.sshfl [vmem:[#allocation1 + $0x8] sm:$0xff pattern:$0x75316420]  ;;  %v973_v18 = vld.sshfl [vmem:[#allocation1] sm:$0xff pattern:$0x75316420] }
  0x4c   : > { %979 = vrot.lane.b32.xlu2 %v974_v17, %s1346_s30  ;;  %977 = vrot.lane.b32.xlu1 %v973_v18, %s1346_s30  ;;  %991 = vst [vmem:[#allocation1] ss:$2 sm:$0xff] %v1441_v2 }
  0x53   : > { %v993_v19 = vld.sshfl [vmem:[#allocation1 + $0x8] sm:$0xff pattern:$0x75316420]  ;;  %v992_v20 = vld.sshfl [vmem:[#allocation1] sm:$0xff pattern:$0x75316420] }
  0x54   : > { %998 = vrot.lane.b32.xlu2 %v993_v19, %s1347_s10  ;;  %996 = vrot.lane.b32.xlu1 %v992_v20, %s1347_s10  ;;  %1010 = vst [vmem:[#allocation1] ss:$2 sm:$0xff] %v1441_v2 }
  0x5b   : > { %v1011_v49 = vld.sshfl [vmem:[#allocation1] sm:$0xff pattern:$0x75316420] }
  0x7e   : > { %v885_v28 = vpop.permute.xlu2 %884 }
  0x84   : > { %v346_v22 = vpop.permute.xlu0 %345 }
  0x86   : > { %v904_v31 = vpop.permute.xlu2 %903 }
  0x8e   : > { %v923_v46 = vpop.permute.xlu2 %922 }
  0x96   : > { %v883_v33 = vpop.permute.xlu1 %882  ;;  %v942_v6 = vpop.permute.xlu2 %941 }
  0x97   : > { %v886_v37 = vsel %vm2243_vm2, %v883_v33, %v885_v28  ;;  %v887_v38 = vsel %vm2243_vm2, %v885_v28, %v883_v33  ;;  %vm2249_vm2 = vcmp.lt.s32.totalorder %v1510_v34, 113 }
  0x98   : > { %v888_v55 = vsel %vm1548_vm11, %v887_v38, -3e+38  ;;  %v889_v56 = vsel %vm1564_vm13, %v886_v37, -3e+38  ;;  %vm2263_vm13 = vcmp.lt.s32.totalorder %v1521_v41, 14  ;;  %vm2262_vm11 = vcmp.lt.s32.totalorder %v1531_v43, 14 }
  0x99   : > { %v892_v58 = vrot.slane %v889_v56, 4 }
  0x9a   : > { %v1478_v21 = vpop.f32.mrf.mxu1 }
  0x9b   : > { %v893_v60 = vsel %vm2252_vm0, %v888_v55, %v892_v58  ;;  %v1012_v55 = vld.sshfl [vmem:[#allocation1 + $0x8] sm:$0xff pattern:$0x75316420] }
  0x9c   : > { %v895_v62 = vmax.f32 %v1441_v2, %v893_v60  ;;  %v2280_v2 = vmov 0 }
  0x9d   : > { %v2281_v2 = vsel %vm1603_vm8, 4294967295, %v2280_v2 }
  0x9e   : > { %v902_v44 = vpop.permute.xlu1 %901  ;;  %v961_v17 = vpop.permute.xlu2 %960 }
  0x9f   : > { %v905_v48 = vsel %vm2244_vm7, %v902_v44, %v904_v31  ;;  %v906_v51 = vsel %vm2244_vm7, %v904_v31, %v902_v44  ;;  %vm298_vm7 = vcmp.ge.s32.totalorder %v1519_v40, 4294967295 }
  0xa0   : > { %v1488_v26 = vpop.f32.mrf.mxu3  ;;  %v907_v53 = vsel %vm1535_vm5, %v906_v51, -3e+38  ;;  %v908_v54 = vsel %vm1554_vm12, %v905_v48, -3e+38 }
  0xa1   : > { %v911_v57 = vrot.slane %v908_v54, 4  ;;  %v2286_v54 = vmov 0 }
  0xa2   : > { %v407_v23 = vpop.f32.mrf.mxu1 }
  0xa3   : > { %v408_v24 = vadd.f32 %v407_v23, %v346_v22  ;;  %v912_v59 = vsel %vm2252_vm0, %v907_v53, %v911_v57  ;;  %v2288_v57 = vmov 0 }
  0xa4   : > { %v914_v3 = vmax.f32 %v895_v62, %v912_v59 }
  0xa5   : > { %v1480_v25 = vmax.f32 %v408_v24, 0.0 }
  0xa6   : > { %v921_v61 = vpop.permute.xlu1 %920  ;;  %v980_v31 = vpop.permute.xlu2 %979 }
  0xa7   : > { %588 = vrot.lane.b32.xlu0 %v1480_v25, %s1345_s29  ;;  %601 = vrot.lane.b32.xlu2 %v1480_v25, %s1348_s11  ;;  %v924_v0 = vsel %vm2245_vm3, %v921_v61, %v923_v46  ;;  %v925_v1 = vsel %vm2245_vm3, %v923_v46, %v921_v61  ;;  %vm299_vm3 = vcmp.ge.s32.totalorder %v1529_v42, 4294967295 }
  0xa8   : > { %614 = vrot.lane.b32.xlu1 %v1480_v25, %s1349_s12  ;;  %v384_v27 = vpop.f32.mrf.mxu3  ;;  %v926_v4 = vsel %vm1591_vm4, %v925_v1, -3e+38  ;;  %v927_v5 = vsel %vm1603_vm8, %v924_v0, -3e+38  ;;  %vm304_vm8 = vcmp.ge.s32.totalorder %v1519_v40, 4294967294  ;;  %vm306_vm4 = vcmp.lt.s32.totalorder %v1519_v40, 14 }
  0xa9   : > { %v385_v29 = vadd.f32 %v384_v27, %v346_v22  ;;  %v930_v7 = vrot.slane %v927_v5, 4 }
  0xab   : > { %v1502_v30 = vmax.f32 %v385_v29, 0.0  ;;  %v931_v8 = vsel %vm2252_vm0, %v926_v4, %v930_v7 }
  0xac   : > { %v933_v9 = vmax.f32 %v914_v3, %v931_v8 }
  0xae   : > { %v940_v10 = vpop.permute.xlu1 %939  ;;  %v999_v36 = vpop.permute.xlu2 %998 }
  0xaf   : > { %562 = vrot.lane.b32.xlu0 %v1480_v25, %s1350_s13  ;;  %575 = vrot.lane.b32.xlu2 %v1480_v25, %s1344_s26  ;;  %v943_v11 = vsel %vm2246_vm9, %v940_v10, %v942_v6  ;;  %v944_v12 = vsel %vm2246_vm9, %v942_v6, %v940_v10  ;;  %vm300_vm9 = vcmp.lt.s32.totalorder %v1519_v40, 15  ;;  %v336_v6 = vld [vmem:[%s2236_s2] sm:$0xff] }
  0xb0   : > { %745 = vrot.lane.b32.xlu1 %v1480_v25, %s1351_s14  ;;  %v945_v13 = vsel %vm2254_vm6, %v944_v12, -3e+38  ;;  %v946_v14 = vsel %vm2253_vm10, %v943_v11, -3e+38 }
  0xb1   : > { %v949_v15 = vrot.slane %v946_v14, 4 }
  0xb3   : > { %v950_v16 = vsel %vm2252_vm0, %v945_v13, %v949_v15 }
  0xb4   : > { %v952_v18 = vmax.f32 %v933_v9, %v950_v16 }
  0xb6   : > { %v959_v19 = vpop.permute.xlu1 %958 }
  0xb7   : > { %717 = vrot.lane.b32.xlu0 %v1480_v25, %s1352_s15  ;;  %730 = vrot.lane.b32.xlu2 %v1480_v25, %s1353_s16  ;;  %v962_v20 = vsel %vm2250_vm1, %v959_v19, %v961_v17  ;;  %v963_v22 = vsel %vm2250_vm1, %v961_v17, %v959_v19 }
  0xb8   : > { %547 = vrot.lane.b32.xlu1 %v1480_v25, %s1354_s17  ;;  %v964_v23 = vsel %vm2248_vm14, %v962_v20, -3e+38  ;;  %v965_v24 = vsel %vm2247_vm15, %v963_v22, -3e+38  ;;  %vm301_vm15 = vcmp.lt.s32.totalorder %v1529_v42, 15  ;;  %vm1665_vm14 = vmand %vm298_vm7, %vm300_vm9  ;;  %vm2261_vm9 = vcmp.ge.s32.totalorder %v1531_v43, 2 }
  0xb9   : > { %v968_v27 = vrot.slane %v965_v24, 4  ;;  %vm1670_vm1 = vmand %vm299_vm3, %vm301_vm15  ;;  %vm2259_vm3 = vcmp.ge.s32.totalorder %v1521_v41, 2 }
  0xba   : > { %v2285_v39 = vsel %vm1670_vm1, 4294967295, %v2284_v39  ;;  %vm1695_vm7 = vmand %vm1670_vm1, %vm2253_vm10 }
  0xbb   : > { %v969_v28 = vsel %vm2252_vm0, %v964_v23, %v968_v27  ;;  %v2287_v54 = vsel %vm1695_vm7, 4294967295, %v2286_v54  ;;  %vm1705_vm15 = vmand %vm1665_vm14, %vm2254_vm6  ;;  %v763_v27 = vld [vmem:[%s2238_s4 + $0x8] sm:$0xff]  ;;  %vm603_vm6 = vcmp.lt.s32.totalorder %v1510_v34, 126 }
  0xbc   : > { %v971_v29 = vmax.f32 %v952_v18, %v969_v28  ;;  %v2289_v57 = vsel %vm1705_vm15, 4294967295, %v2288_v57  ;;  %vm620_vm10 = vmand %vm1670_vm1, %vm2261_vm9 }
  0xbd   : > { %vm1819_vm9 = vmand %vm304_vm8, %vm306_vm4  ;;  %vm2297_vm4 = vcmp.lt.s32.totalorder %v1531_v43, 15  ;;  %vm747_vm8 = vcmp.lt.s32.totalorder %v1510_v34, 94 }
  0xbe   : > { %v978_v32 = vpop.permute.xlu1 %977 }
  0xbf   : > { %702 = vrot.lane.b32.xlu0 %v1480_v25, %s1355_s18  ;;  %586 = vrot.lane.b32.xlu2 %v1502_v30, %s1345_s29  ;;  %s1358_s29 = smov 111   ;;  %v981_v33 = vsel %vm2249_vm2, %v978_v32, %v980_v31  ;;  %v982_v35 = vsel %vm2249_vm2, %v980_v31, %v978_v32  ;;  %vm2251_vm2 = vcmp.lt.s32.totalorder %v1510_v34, 112 }
  0xc0   : > { %532 = vrot.lane.b32.xlu1 %v1480_v25, %s1343_s23  ;;  %v984_v56 = vsel %vm1695_vm7, %v982_v35, -3e+38  ;;  %v983_v59 = vsel %vm1705_vm15, %v981_v33, -3e+38  ;;  %vm307_vm7 = vcmp.lt.s32.totalorder %v1529_v42, 14 }
  0xc1   : > { %v987_v58 = vrot.slane %v984_v56, 4 }
  0xc3   : > { %v988_v60 = vsel %vm2252_vm0, %v983_v59, %v987_v58 }
  0xc4   : > { %v1717_v61 = vmax.f32 %v971_v29, %v988_v60 }
  0xc6   : > { %v997_v38 = vpop.permute.xlu1 %996 }
  0xc7   : > { %687 = vrot.lane.b32.xlu0 %v1480_v25, %s1356_s19  ;;  %560 = vrot.lane.b32.xlu2 %v1502_v30, %s1350_s13  ;;  %s1359_s13 = smov 18   ;;  %v1000_v44 = vsel %vm2251_vm2, %v997_v38, %v999_v36  ;;  %v1001_v46 = vsel %vm2251_vm2, %v999_v36, %v997_v38  ;;  %vm616_vm2 = vcmp.lt.s32.totalorder %v1510_v34, 114 }
  0xc8   : > { %519 = vrot.lane.b32.xlu1 %v1480_v25, %s1342_s22  ;;  %v1002_v48 = vsel %vm1665_vm14, %v1000_v44, -3e+38 }
  0xcf   : > { %672 = vrot.lane.b32.xlu0 %v1480_v25, %s1357_s20  ;;  %1015 = vrot.lane.b32.xlu2 %v1011_v49, %s1358_s29  ;;  %v1003_v49 = vsel %vm1670_vm1, %v1001_v46, -3e+38 }
  0xd0   : > { %504 = vrot.lane.b32.xlu1 %v1480_v25, %s1341_s21  ;;  %v1006_v51 = vrot.slane %v1003_v49, 4 }
  0xd2   : > { %v1687_v53 = vsel %vm2252_vm0, %v1002_v48, %v1006_v51  ;;  %vm619_vm0 = vmand %vm1665_vm14, %vm2259_vm3  ;;  %vm305_vm3 = vcmp.ge.s32.totalorder %v1529_v42, 4294967294 }
  0xd3   : > { %v1009_v62 = vmax.f32 %v1717_v61, %v1687_v53 }
  0xd7   : > { %657 = vrot.lane.b32.xlu0 %v1480_v25, %s1358_s29  ;;  %715 = vrot.lane.b32.xlu2 %v1502_v30, %s1352_s15  ;;  %s1360_s15 = smov 30  }
  0xd8   : > { %489 = vrot.lane.b32.xlu1 %v1480_v25, %s1359_s13 }
  0xdf   : > { %644 = vrot.lane.b32.xlu0 %v1480_v25, %s1347_s10  ;;  %700 = vrot.lane.b32.xlu2 %v1502_v30, %s1355_s18  ;;  %s1361_s18 = smov 31  }
  0xe0   : > { %474 = vrot.lane.b32.xlu1 %v1480_v25, %s1360_s15 }
  0xe7   : > { %629 = vrot.lane.b32.xlu0 %v1480_v25, %s1346_s30  ;;  %685 = vrot.lane.b32.xlu2 %v1502_v30, %s1356_s19 }
  0xe8   : > { %459 = vrot.lane.b32.xlu1 %v1480_v25, %s1361_s18 }
  0xef   : > { %670 = vrot.lane.b32.xlu2 %v1502_v30, %s1357_s20  ;;  %612 = vrot.lane.b32.xlu0 %v1502_v30, %s1349_s12 }
  0xf0   : > { %599 = vrot.lane.b32.xlu1 %v1502_v30, %s1348_s11 }
  0xf7   : > { %655 = vrot.lane.b32.xlu2 %v1502_v30, %s1358_s29  ;;  %743 = vrot.lane.b32.xlu0 %v1502_v30, %s1351_s14 }
  0xf8   : > { %573 = vrot.lane.b32.xlu1 %v1502_v30, %s1344_s26  ;;  %s1362_s26 = smov 32  }
  0xff   : > { %642 = vrot.lane.b32.xlu2 %v1502_v30, %s1347_s10  ;;  %1017 = vrot.lane.b32.xlu0 %v1012_v55, %s1358_s29  ;;  %s1363_s10 = smov 33  }
 0x100   : > { %728 = vrot.lane.b32.xlu1 %v1502_v30, %s1353_s16  ;;  %s266_s16 = sand.u32 1, %s1330_s24  }
 0x101   : > { %v1721_v0 = vpop.permute.xlu2 %601 }
 0x107   : > { %627 = vrot.lane.b32.xlu2 %v1502_v30, %s1346_s30  ;;  %545 = vrot.lane.b32.xlu0 %v1502_v30, %s1354_s17  ;;  %s1364_s30 = smov 34   ;;  %s1193_s17 = sshll.u32 %s266_s16, 6 }
 0x108   : > { %446 = vrot.lane.b32.xlu1 %v1480_v25, %s1362_s26  ;;  %s2109_s20 = scalar_lea.vmem [#allocation2], %s1193_s17 }
 0x109   : > { %v1731_v1 = vpop.permute.xlu2 %575 }
 0x10f   : > { %431 = vrot.lane.b32.xlu2 %v1480_v25, %s1363_s10  ;;  %530 = vrot.lane.b32.xlu0 %v1502_v30, %s1343_s23 }
 0x110   : > { %429 = vrot.lane.b32.xlu1 %v1502_v30, %s1363_s10 }
 0x111   : > { %v1737_v4 = vpop.permute.xlu2 %730 }
 0x117   : > { %517 = vrot.lane.b32.xlu0 %v1502_v30, %s1342_s22  ;;  %s1263_s22 = sshll.u32 (%p1430_p4), %s1418_s27, 4 }
 0x118   : > { %416 = vrot.lane.b32.xlu1 %v1480_v25, %s1364_s30  ;;  %s1106_s16 = scalar_lea.vmem (%p1430_p4), %s2241_s7, %s1263_s22 }
 0x119   : > { %v589_v3 = vpop.permute.xlu0 %588  ;;  %v587_v9 = vpop.permute.xlu2 %586 }
 0x11a   : > { %v615_v5 = vpop.permute.xlu1 %614 }
 0x11f   : > { %502 = vrot.lane.b32.xlu0 %v1502_v30, %s1341_s21 }
 0x120   : > { %340 = vperm.xlu1 %1315, %v336_v6  }
 0x121   : > { %v1744_v7 = vpop.permute.xlu0 %562  ;;  %v1754_v12 = vpop.permute.xlu2 %560 }
 0x122   : > { %v1746_v8 = vpop.permute.xlu1 %745 }
 0x127   : > { %487 = vrot.lane.b32.xlu0 %v1502_v30, %s1359_s13 }
 0x129   : > { %v1750_v10 = vpop.permute.xlu0 %717  ;;  %v1764_v15 = vpop.permute.xlu2 %1015 }
 0x12a   : > { %v1752_v11 = vpop.permute.xlu1 %547 }
 0x12f   : > { %472 = vrot.lane.b32.xlu0 %v1502_v30, %s1360_s15 }
 0x131   : > { %v1758_v13 = vpop.permute.xlu0 %702  ;;  %v1773_v19 = vpop.permute.xlu2 %715 }
 0x132   : > { %v1760_v14 = vpop.permute.xlu1 %532 }
 0x137   : > { %457 = vrot.lane.b32.xlu0 %v1502_v30, %s1361_s18 }
 0x139   : > { %v1766_v16 = vpop.permute.xlu0 %687  ;;  %v1782_v24 = vpop.permute.xlu2 %700 }
 0x13a   : > { %v1768_v17 = vpop.permute.xlu1 %519 }
 0x13f   : > { %444 = vrot.lane.b32.xlu0 %v1502_v30, %s1362_s26 }
 0x141   : > { %v1771_v18 = vpop.permute.xlu0 %672  ;;  %v1791_v31 = vpop.permute.xlu2 %685 }
 0x142   : > { %v1775_v20 = vpop.permute.xlu1 %504 }
 0x147   : > { %414 = vrot.lane.b32.xlu0 %v1502_v30, %s1364_s30 }
 0x149   : > { %v1778_v22 = vpop.permute.xlu0 %657  ;;  %v1804_v35 = vpop.permute.xlu2 %670 }
 0x14a   : > { %v1780_v23 = vpop.permute.xlu1 %489 }
 0x14f   : > { %771 = vperm.xlu0 %1313, %v763_v27  }
 0x151   : > { %v1787_v28 = vpop.permute.xlu0 %644  ;;  %v1850_v60 = vpop.permute.xlu2 %655 }
 0x152   : > { %v1789_v29 = vpop.permute.xlu1 %474 }
 0x159   : > { %v1793_v32 = vpop.permute.xlu0 %629 }
 0x15a   : > { %v1795_v33 = vpop.permute.xlu1 %459 }
 0x161   : > { %v613_v36 = vpop.permute.xlu0 %612 }
 0x162   : > { %v600_v38 = vpop.permute.xlu1 %599  ;;  %v617_v44 = vsel %vm616_vm2, %v613_v36, %v615_v5  ;;  %v618_v46 = vsel %vm616_vm2, %v615_v5, %v613_v36  ;;  %vm1827_vm2 = vmand %vm305_vm3, %vm307_vm7 }
 0x163   : > { %1202 = vmatpush.msk.msra.mxu2 %vm619_vm0, %v617_v44  ;;  %1228 = vmatpush.msk.msra.mxu0 %vm620_vm10, %v618_v46  ;;  %v604_v48 = vsel %vm603_vm6, %v600_v38, %v1721_v0  ;;  %v605_v49 = vsel %vm603_vm6, %v1721_v0, %v600_v38  ;;  %vm2294_vm0 = vcmp.lt.s32.totalorder %v1510_v34, 127  ;;  %vm2296_vm6 = vcmp.lt.s32.totalorder %v1521_v41, 15  ;;  %vm750_vm7 = vmand %vm1819_vm9, %vm2263_vm13 }
 0x164   : > { %v591_v56 = vsel %vm2294_vm0, %v587_v9, %v589_v3  ;;  %vm2295_vm10 = vmmov %vm2294_vm0  ;;  %vm564_vm0 = vcmp.lt.s32.totalorder %v1510_v34, 2 }
 0x165   : > { %1203 = vmatpush.msk.msra.mxu2 %vm2263_vm13, %v604_v48  ;;  %1229 = vmatpush.msk.msra.mxu0 %vm2262_vm11, %v605_v49  ;;  %v592_v58 = vsel %vm2295_vm10, %v589_v3, %v587_v9  ;;  %vm751_vm3 = vmand %vm1827_vm2, %vm2262_vm11  ;;  %vm2298_vm10 = vcmp.lt.s32.totalorder %v1510_v34, 1  ;;  %vm2301_vm11 = vcmp.ge.s32.totalorder %v1531_v43, 1  ;;  %v2311_v9 = vmov 0 }
 0x166   : > { %vm2315_vm13 = vcmp.ge.s32.totalorder %v1521_v41, 1 }
 0x167   : > { %1204 = vmatpush.msk.msra.mxu2 %vm2296_vm6, %v591_v56  ;;  %1230 = vmatpush.msk.msra.mxu0 %vm2297_vm4, %v592_v58  ;;  %vm2299_vm6 = vmmov %vm2298_vm10  ;;  %vm2300_vm4 = vcmp.ge.s32.totalorder %v1521_v41, 1  ;;  %v643_v58 = vpop.permute.xlu2 %642 }
 0x168   : > { %vm1918_vm15 = vmand %vm1819_vm9, %vm2315_vm13  ;;  %vm704_vm13 = vcmp.lt.s32.totalorder %v1510_v34, 97 }
 0x169   : > { %784 = vmatpush.msra.mxu2 %v1502_v30  ;;  %830 = vmatpush.msra.mxu0 %v1480_v25  ;;  %v744_v59 = vpop.permute.xlu0 %743  ;;  %v566_v25 = vsel %vm564_vm0, %v1744_v7, %v1754_v12  ;;  %v706_v51 = vsel %vm704_vm13, %v1758_v13, %v1782_v24 }
 0x16a   : > { %v574_v0 = vpop.permute.xlu1 %573  ;;  %v748_v3 = vsel %vm747_vm8, %v744_v59, %v1746_v8  ;;  %v749_v5 = vsel %vm747_vm8, %v1746_v8, %v744_v59  ;;  %v565_v8 = vsel %vm564_vm0, %v1754_v12, %v1744_v7  ;;  %vm2302_vm8 = vcmp.ge.s32.totalorder %v1521_v41, 2 }
 0x16b   : > { %v579_v6 = vsel %vm2298_vm10, %v1731_v1, %v574_v0  ;;  %1217 = vmatpush.msk.msrb.mxu3 %vm750_vm7, %v748_v3  ;;  %v578_v30 = vsel %vm2299_vm6, %v574_v0, %v1731_v1  ;;  %1243 = vmatpush.msk.msrb.mxu1 %vm751_vm3, %v749_v5  ;;  %vm2303_vm7 = vcmp.ge.s32.totalorder %v1531_v43, 2  ;;  %vm2304_vm3 = vcmp.lt.s32.totalorder %v1521_v41, 15 }
 0x16c   : > { %1205 = vmatpush.msk.msra.mxu2 %vm2300_vm4, %v579_v6  ;;  %1231 = vmatpush.msk.msra.mxu0 %vm2301_vm11, %v578_v30  ;;  %vm1877_vm10 = vmand %vm1819_vm9, %vm2304_vm3  ;;  %vm2307_vm11 = vcmp.lt.s32.totalorder %v1531_v43, 15  ;;  %vm732_vm0 = vcmp.lt.s32.totalorder %v1510_v34, 95  ;;  %v705_v30 = vsel %vm704_vm13, %v1782_v24, %v1758_v13  ;;  %vm674_vm13 = vcmp.lt.s32.totalorder %v1510_v34, 110 }
 0x16d   : > { %vm1885_vm6 = vmand %vm1827_vm2, %vm2307_vm11 }
 0x16e   : > { %1206 = vmatpush.msk.msra.mxu2 %vm2302_vm8, %v566_v25  ;;  %1232 = vmatpush.msk.msra.mxu0 %vm2303_vm7, %v565_v8  ;;  %vm2310_vm4 = vmmov %vm2307_vm11  ;;  %vm2267_vm7 = vcmp.lt.s32.totalorder %v1510_v34, 111  ;;  %v676_v8 = vsel %vm674_vm13, %v1771_v18, %v1804_v35 }
 0x16f   : > { %vm1894_vm8 = vmand %vm1670_vm1, %vm2310_vm4  ;;  %vm719_vm4 = vcmp.lt.s32.totalorder %v1510_v34, 96  ;;  %v628_v7 = vpop.permute.xlu2 %627 }
 0x170   : > { %v2312_v9 = vsel %vm1894_vm8, 4294967295, %v2311_v9  ;;  %vm1903_vm11 = vmand %vm1665_vm14, %vm2304_vm3  ;;  %vm2318_vm3 = vcmp.ge.s32.totalorder %v1531_v43, 1  ;;  %v720_v0 = vsel %vm719_vm4, %v1773_v19, %v1750_v10  ;;  %v721_v3 = vsel %vm719_vm4, %v1750_v10, %v1773_v19 }
 0x171   : > { %v1018_v12 = vpop.permute.xlu0 %1017  ;;  %vm1928_vm1 = vmand %vm1827_vm2, %vm2318_vm3  ;;  %vm2327_vm4 = vcmp.lt.s32.totalorder %v1521_v41, 14 }
 0x172   : > { %v729_v36 = vpop.permute.xlu1 %728  ;;  %v1019_v38 = vsel %vm2267_vm7, %v1764_v15, %v1018_v12  ;;  %v1020_v44 = vsel %vm2267_vm7, %v1018_v12, %v1764_v15  ;;  %vm1970_vm7 = vmand %vm1535_vm5, %vm2327_vm4  ;;  %v761_v15 = vld [vmem:[%s2237_s3 + $0x18] sm:$0xff] }
 0x173   : > { %v733_v48 = vsel %vm732_vm0, %v729_v36, %v1737_v4  ;;  %v734_v49 = vsel %vm732_vm0, %v1737_v4, %v729_v36  ;;  %v1022_v56 = vsel %vm1894_vm8, %v1020_v44, -3e+38  ;;  %vm2321_vm0 = vcmp.ge.s32.totalorder %v1521_v41, 2  ;;  %v1030_v4 = vld [vmem:[%s2240_s6] sm:$0xff] }
 0x174   : > { %1218 = vmatpush.msk.msrb.mxu3 %vm1877_vm10, %v733_v48  ;;  %1244 = vmatpush.msk.msrb.mxu1 %vm1885_vm6, %v734_v49  ;;  %vm1943_vm3 = vmand %vm1819_vm9, %vm2321_vm0  ;;  %v1025_v59 = vrot.slane %v1022_v56, 4  ;;  %vm2324_vm10 = vcmp.ge.s32.totalorder %v1531_v43, 2  ;;  %v1021_v6 = vsel %vm1903_vm11, %v1019_v38, -3e+38  ;;  %vm689_vm0 = vcmp.lt.s32.totalorder %v1510_v34, 98 }
 0x175   : > { %vm1955_vm6 = vmand %vm1827_vm2, %vm2324_vm10  ;;  %vm2330_vm10 = vcmask 1043456   ;;  %v690_v13 = vsel %vm689_vm0, %v1791_v31, %v1766_v16  ;;  %v691_v53 = vsel %vm689_vm0, %v1766_v16, %v1791_v31  ;;  %v675_v31 = vsel %vm674_vm13, %v1804_v35, %v1771_v18 }
 0x176   : > { %1219 = vmatpush.msk.msrb.mxu3 %vm1819_vm9, %v720_v0  ;;  %1245 = vmatpush.msk.msrb.mxu1 %vm1827_vm2, %v721_v3  ;;  %v1026_v19 = vsel %vm2330_vm10, %v1021_v6, %v1025_v59  ;;  %vm2331_vm2 = vmmov %vm2327_vm4  ;;  %vm2334_vm4 = vcmp.lt.s32.totalorder %v1531_v43, 14 }
 0x177   : > { %vm1984_vm8 = vmand %vm1665_vm14, %vm2331_vm2  ;;  %v1028_v25 = vmax.f32 %v1009_v62, %v1026_v19  ;;  %v432_v3 = vpop.permute.xlu2 %431  ;;  %v758_v19 = vld [vmem:[%s2237_s3] sm:$0xff] }
 0x178   : > { %1220 = vmatpush.msk.msrb.mxu3 %vm1918_vm15, %v705_v30  ;;  %1246 = vmatpush.msk.msrb.mxu1 %vm1928_vm1, %v706_v51  ;;  %vm553_vm10 = vmand %vm1554_vm12, %vm2334_vm4  ;;  %vm2336_vm15 = vnez %v2285_v39  ;;  %vm2337_vm1 = vcmp.lt.s32.totalorder %v1510_v34, 14 }
 0x179   : > { %v546_v61 = vpop.permute.xlu0 %545  ;;  %vm2335_vm2 = vmmov %vm2334_vm4  ;;  %1037 = vst [vmem:[#allocation1] ss:$2 sm:$0xff] %v1028_v25  ;;  %vm2346_vm4 = vnez %v2289_v57 }
 0x17a   : > { %vm678_vm9 = vmand %vm2336_vm15, %vm2335_vm2  ;;  %v2008_v62 = vpop.permute.xlu1 %446  ;;  %1221 = vmatpush.msk.msrb.mxu3 %vm1943_vm3, %v690_v13  ;;  %1247 = vmatpush.msk.msrb.mxu1 %vm1955_vm6, %v691_v53  ;;  %v551_v24 = vsel %vm2337_vm1, %v1752_v11, %v546_v61  ;;  %vm2339_vm3 = vcmp.lt.s32.totalorder %v1510_v34, 111  ;;  %vm2341_vm6 = vnez %v2312_v9 }
 0x17b   : > { %vm2338_vm0 = vmmov %vm2337_vm1  ;;  %1207 = vmatpush.msk.msra.mxu2 %vm1970_vm7, %v551_v24  ;;  %v660_v1 = vsel %vm2339_vm3, %v1850_v60, %v1778_v22 }
 0x17c   : > { %v550_v16 = vsel %vm2338_vm0, %v546_v61, %v1752_v11  ;;  %1222 = vmatpush.msk.msrb.mxu3 %vm1984_vm8, %v675_v31  ;;  %1248 = vmatpush.msk.msrb.mxu1 %vm678_vm9, %v676_v8  ;;  %vm2340_vm7 = vmmov %vm2339_vm3  ;;  %vm2342_vm8 = vcmp.lt.s32.totalorder %v1510_v34, 112  ;;  %vm2352_vm0 = vnez %v2279_v63  ;;  %vm2353_vm3 = vnez %v2281_v2  ;;  %v759_v63 = vld [vmem:[%s2237_s3 + $0x8] sm:$0xff] }
 0x17d   : > { %1233 = vmatpush.msk.msra.mxu0 %vm553_vm10, %v550_v16  ;;  %v661_v11 = vsel %vm2340_vm7, %v1778_v22, %v1850_v60  ;;  %v647_v18 = vsel %vm2342_vm8, %v643_v58, %v1787_v28  ;;  %vm2343_vm9 = vmmov %vm2342_vm8  ;;  %vm2348_vm10 = vcmp.lt.s32.totalorder %v1510_v34, 15  ;;  %vm2354_vm7 = vcmp.lt.s32.totalorder %v1510_v34, 16 }
 0x17e   : > { %1223 = vmatpush.msk.msrb.mxu3 %vm1903_vm11, %v660_v1  ;;  %1249 = vmatpush.msk.msrb.mxu1 %vm2341_vm6, %v661_v11  ;;  %v648_v35 = vsel %vm2343_vm9, %v1787_v28, %v643_v58  ;;  %vm2344_vm11 = vcmp.lt.s32.totalorder %v1510_v34, 113  ;;  %vm2349_vm2 = vmmov %vm2348_vm10  ;;  %vm774_vm8 = vcmask 588800   ;;  %vm2356_vm9 = vcmp.lt.s32.totalorder %v1510_v34, 17 }
 0x17f   : > { %v632_v9 = vsel %vm2344_vm11, %v628_v7, %v1793_v32  ;;  %vm2345_vm13 = vmmov %vm2344_vm11 }
 0x180   : > { %1224 = vmatpush.msk.msrb.mxu3 %vm1665_vm14, %v647_v18  ;;  %1250 = vmatpush.msk.msrb.mxu1 %vm2336_vm15, %v648_v35  ;;  %v1038_v22 = vld.sshfl [vmem:[#allocation1] sm:$0xff pattern:$0x75316420]  ;;  %v1039_v60 = vld.sshfl [vmem:[#allocation1 + $0x8] sm:$0xff pattern:$0x75316420]  ;;  %v633_v12 = vsel %vm2345_vm13, %v1793_v32, %v628_v7  ;;  %vm2347_vm14 = vnez %v2287_v54  ;;  %vm2355_vm6 = vmmov %vm2354_vm7  ;;  %vm2358_vm13 = vnez %v2273_v47 }
 0x181   : > { %v531_v27 = vpop.permute.xlu0 %530  ;;  %vm2350_vm15 = vcmask 1043456   ;;  %vm2357_vm11 = vmmov %vm2356_vm9 }
 0x182   : > { %v2056_v36 = vpop.permute.xlu1 %429  ;;  %1225 = vmatpush.msk.msrb.mxu3 %vm2346_vm4, %v632_v9  ;;  %1251 = vmatpush.msk.msrb.mxu1 %vm2347_vm14, %v633_v12  ;;  %v536_v37 = vsel %vm2348_vm10, %v1760_v14, %v531_v27  ;;  %v535_v39 = vsel %vm2349_vm2, %v531_v27, %v1760_v14  ;;  %vm2351_vm1 = vmmov %vm2350_vm15  ;;  %vm2359_vm4 = vnez %v2277_v52  ;;  %vm491_vm14 = vcmp.lt.s32.totalorder %v1510_v34, 18 }
 0x183   : > { %1208 = vmatpush.msk.msra.mxu2 %vm2352_vm0, %v536_v37  ;;  %1234 = vmatpush.msk.msra.mxu0 %vm2353_vm3, %v535_v39  ;;  %vm2360_vm10 = vcmp.ge.s32.totalorder %v1521_v41, 2  ;;  %vm286_vm0 = vcmp.ge.s32.totalorder %v1519_v40, 2  ;;  %vm288_vm3 = vcmp.lt.s32.totalorder %v1519_v40, 18 }
 0x184   : > { %1254 = vmatpush.msk.msra.mxu3 %vm2350_vm15, %v1038_v22  ;;  %1256 = vmatpush.msk.msra.mxu1 %vm2351_vm1, %v1039_v60  ;;  %vm494_vm2 = vmand %vm1535_vm5, %vm2360_vm10  ;;  %vm2361_vm15 = vcmp.ge.s32.totalorder %v1531_v43, 2 }
 0x185   : > { %1226 = vmatmul.msk.f32.vlgmr.msrb.gmra.mxu3 %vm774_vm8, %v759_v63  ;;  %1252 = vmatmul.msk.f32.vlgmr.msrb.gmra.mxu1 %vm774_vm8, %v759_v63  ;;  %vm495_vm1 = vmand %vm1554_vm12, %vm2361_vm15  ;;  %vm2370_vm15 = vcmp.lt.s32.totalorder %v1521_v41, 15 }
 0x189   : > { %v518_v54 = vpop.permute.xlu0 %517 }
 0x18a   : > { %v2074_v57 = vpop.permute.xlu1 %416  ;;  %v523_v28 = vsel %vm2354_vm7, %v1768_v17, %v518_v54  ;;  %v522_v14 = vsel %vm2355_vm6, %v518_v54, %v1768_v17  ;;  %vm287_vm7 = vcmp.ge.s32.totalorder %v1529_v42, 2  ;;  %vm289_vm6 = vcmp.lt.s32.totalorder %v1529_v42, 18 }
 0x18b   : > { %1209 = vmatpush.msk.msra.mxu2 %vm1535_vm5, %v523_v28  ;;  %1235 = vmatpush.msk.msra.mxu0 %vm1554_vm12, %v522_v14  ;;  %vm2128_vm5 = vmand %vm286_vm0, %vm288_vm3  ;;  %vm2371_vm0 = vcmp.lt.s32.totalorder %v1531_v43, 15 }
 0x18c   : > { %vm2135_vm12 = vmand %vm287_vm7, %vm289_vm6  ;;  %vm448_vm7 = vcmp.lt.s32.totalorder %v1510_v34, 32  ;;  %vm433_vm6 = vcmp.lt.s32.totalorder %v1510_v34, 33 }
 0x18d   : > { %1227 = vmatmul.msk.f32.gmra.mxu3 %vm774_vm8, %v761_v15  ;;  %1253 = vmatmul.msk.f32.gmra.mxu1 %vm774_vm8, %v761_v15  ;;  %vm2366_vm8 = vcmask 31744   ;;  %vm465_vm3 = vmand %vm2135_vm12, %vm2371_vm0  ;;  %v435_v5 = vsel %vm433_vm6, %v432_v3, %v2056_v36  ;;  %v434_v6 = vsel %vm433_vm6, %v2056_v36, %v432_v3 }
 0x191   : > { %v503_v2 = vpop.permute.xlu0 %502 }
 0x192   : > { %v341_v32 = vpop.permute.xlu1 %340  ;;  %v508_v17 = vsel %vm2356_vm9, %v1775_v20, %v503_v2  ;;  %v507_v38 = vsel %vm2357_vm11, %v503_v2, %v1775_v20  ;;  %vm2367_vm9 = vmmov %vm2366_vm8  ;;  %vm476_vm11 = vcmp.lt.s32.totalorder %v1510_v34, 30 }
 0x193   : > { %v382_v44 = vadd.f32 %v1488_v26, %v341_v32  ;;  %v405_v46 = vadd.f32 %v1478_v21, %v341_v32  ;;  %1210 = vmatpush.msk.msra.mxu2 %vm2358_vm13, %v508_v17  ;;  %1236 = vmatpush.msk.msra.mxu0 %vm2359_vm4, %v507_v38  ;;  %vm2368_vm13 = vcmp.lt.s32.totalorder %v1521_v41, 14 }
 0x194   : > { %vm479_vm4 = vmand %vm2128_vm5, %vm2368_vm13 }
 0x195   : > { %v410_v48 = vmax.f32 %v382_v44, 0.0  ;;  %v411_v49 = vmax.f32 %v405_v46, 0.0  ;;  %1255 = vmatmul.msk.f32.vlgmr.msra.gmra.mxu3 %vm2366_vm8, %v1029_v50  ;;  %1257 = vmatmul.msk.f32.vlgmr.msra.gmra.mxu1 %vm2367_vm9, %v1029_v50  ;;  %vm2372_vm8 = vcmp.ge.s32.totalorder %v1521_v41, 1 }
 0x196   : > { %vm436_vm9 = vmand %vm2128_vm5, %vm2372_vm8 }
 0x197   : > { %1089 = vst [vmem:[%s2109_s20] sm:$0xff] %v410_v48 }
 0x198   : > { %1090 = vst [vmem:[%s2109_s20 + $0x8] sm:$0xff] %v411_v49 }
 0x199   : > { %v488_v21 = vpop.permute.xlu0 %487 }
 0x19a   : > { %v493_v26 = vsel %vm491_vm14, %v1780_v23, %v488_v21  ;;  %v492_v47 = vsel %vm491_vm14, %v488_v21, %v1780_v23  ;;  %vm2369_vm14 = vcmp.lt.s32.totalorder %v1531_v43, 14  ;;  %v762_v23 = vld [vmem:[%s2238_s4] sm:$0xff] }
 0x19b   : > { %1211 = vmatpush.msk.msra.mxu2 %vm494_vm2, %v493_v26  ;;  %1237 = vmatpush.msk.msra.mxu0 %vm495_vm1, %v492_v47  ;;  %vm480_vm10 = vmand %vm2135_vm12, %vm2369_vm14  ;;  %vm461_vm2 = vcmp.lt.s32.totalorder %v1510_v34, 31  ;;  %vm2374_vm14 = vcmp.ge.s32.totalorder %v1521_v41, 2 }
 0x19c   : > { %766 = vperm.xlu2 %1314, %v762_v23   ;;  %vm464_vm1 = vmand %vm2128_vm5, %vm2370_vm15 }
 0x19e   : > { %v1119_v63 = vld [vmem:[%s2109_s20] sm:$0xff] (%p1430_p4) }
 0x19f   : > { %v1121_v2 = vld [vmem:[%s2109_s20 + $0x8] sm:$0xff] (%p1430_p4)  ;;  %1120 = vst [vmem:[%s1106_s16] sm:$0xff] (%p1430_p4), %v1119_v63 }
 0x1a0   : > { %1122 = vst [vmem:[%s1106_s16 + $0x8] sm:$0xff] (%p1430_p4), %v1121_v2 }
 0x1a1   : > { %v473_v42 = vpop.permute.xlu0 %472 }
 0x1a2   : > { %v478_v52 = vsel %vm476_vm11, %v1789_v29, %v473_v42  ;;  %v477_v20 = vsel %vm476_vm11, %v473_v42, %v1789_v29  ;;  %vm2373_vm11 = vcmp.ge.s32.totalorder %v1531_v43, 1 }
 0x1a3   : > { %1212 = vmatpush.msk.msra.mxu2 %vm479_vm4, %v478_v52  ;;  %1238 = vmatpush.msk.msra.mxu0 %vm480_vm10, %v477_v20  ;;  %vm437_vm13 = vmand %vm2135_vm12, %vm2373_vm11  ;;  %vm418_vm4 = vcmp.lt.s32.totalorder %v1510_v34, 34  ;;  %v760_v34 = vld [vmem:[%s2237_s3 + $0x10] sm:$0xff] }
 0x1a4   : > { %1033 = vperm.xlu2 %1314, %v1030_v4   ;;  %vm421_vm10 = vmand %vm2128_vm5, %vm2374_vm14 }
 0x1a9   : > { %v458_v29 = vpop.permute.xlu0 %457 }
 0x1aa   : > { %v463_v56 = vsel %vm461_vm2, %v1795_v33, %v458_v29  ;;  %v462_v58 = vsel %vm461_vm2, %v458_v29, %v1795_v33  ;;  %vm2375_vm2 = vcmp.ge.s32.totalorder %v1531_v43, 2 }
 0x1ab   : > { %1213 = vmatpush.msk.msra.mxu2 %vm464_vm1, %v463_v56  ;;  %1239 = vmatpush.msk.msra.mxu0 %vm465_vm3, %v462_v58  ;;  %vm422_vm15 = vmand %vm2135_vm12, %vm2375_vm2 }
 0x1b1   : > { %v445_v59 = vpop.permute.xlu0 %444 }
 0x1b2   : > { %v450_v0 = vsel %vm448_vm7, %v2008_v62, %v445_v59  ;;  %v449_v33 = vsel %vm448_vm7, %v445_v59, %v2008_v62 }
 0x1b3   : > { %1214 = vmatpush.msk.msra.mxu2 %vm2128_vm5, %v450_v0  ;;  %1240 = vmatpush.msk.msra.mxu0 %vm2135_vm12, %v449_v33 }
 0x1b5   : > { %1215 = vmatpush.msk.msra.mxu2 %vm436_vm9, %v435_v5  ;;  %1241 = vmatpush.msk.msra.mxu0 %vm437_vm13, %v434_v6 }
 0x1b9   : > { %v415_v10 = vpop.permute.xlu0 %414 }
 0x1ba   : > { %v420_v30 = vsel %vm418_vm4, %v2074_v57, %v415_v10  ;;  %v419_v51 = vsel %vm418_vm4, %v415_v10, %v2074_v57 }
 0x1bb   : > { %1216 = vmatpush.msk.msra.mxu2 %vm421_vm10, %v420_v30  ;;  %1242 = vmatpush.msk.msra.mxu0 %vm422_vm15, %v419_v51 }
 0x1bc   : > { %797 = vmatmul.f32.vlgmr.msra.gmra.mxu2 %v758_v19  ;;  %843 = vmatmul.f32.vlgmr.msra.gmra.mxu0 %v758_v19 }
 0x1c1   : > { %v772_v60 = vpop.permute.xlu0 %771 }
 0x1c4   : > { %800 = vmatmul.f32.gmra.mxu2 %v760_v34  ;;  %846 = vmatmul.f32.gmra.mxu0 %v760_v34 }
 0x1f6   : > { %v767_v55 = vpop.permute.xlu2 %766 }
 0x1fe   : > { %v1034_v53 = vpop.permute.xlu2 %1033 }
 0x202   : > { %v867_v43 = vpop.f32.mrf.mxu1 }
 0x208   : > { %v821_v41 = vpop.f32.mrf.mxu3 }
 0x20a   : > { %v870_v13 = vpop.f32.mrf.mxu1 }
 0x210   : > { %v824_v25 = vpop.f32.mrf.mxu3 }
 0x212   : > { %v1084_v24 = vpop.f32.mrf.mxu1 }
 0x213   : > { %v1085_v16 = vadd.f32 %v1084_v24, %v1034_v53 }
 0x215   : > { %v1088_v8 = vmax.f32 %v1085_v16, 0.0 }
 0x217   : > { %1096 = vst [vmem:[%s2109_s20 + $0x38] sm:$0xff] %v1088_v8 }
 0x218   : > { %v1064_v61 = vpop.f32.mrf.mxu3 }
 0x219   : > { %v1065_v62 = vadd.f32 %v1064_v61, %v1034_v53 }
 0x21b   : > { %v1087_v31 = vmax.f32 %v1065_v62, 0.0 }
 0x21d   : > { %1095 = vst [vmem:[%s2109_s20 + $0x30] sm:$0xff] %v1087_v31 }
 0x21e   : > { %v1133_v48 = vld [vmem:[%s2109_s20 + $0x38] sm:$0xff] (%p1430_p4) }
 0x21f   : > { %1134 = vst [vmem:[%s1106_s16 + $0x68] sm:$0xff] (%p1430_p4), %v1133_v48 }
 0x224   : > { %v1131_v46 = vld [vmem:[%s2109_s20 + $0x30] sm:$0xff] (%p1430_p4) }
 0x225   : > { %1132 = vst [vmem:[%s1106_s16 + $0x60] sm:$0xff] (%p1430_p4), %v1131_v46 }
 0x239   : > { %v844_v1 = vpop.f32.mrf.mxu0 }
 0x23a   : > { %v845_v11 = vadd.f32 %v844_v1, %v767_v55 }
 0x23c   : > { %v868_v7 = vadd.f32 %v867_v43, %v845_v11 }
 0x23e   : > { %v874_v18 = vmax.f32 %v868_v7, 0.0 }
 0x23f   : > { %v798_v35 = vpop.f32.mrf.mxu2 }
 0x240   : > { %1092 = vst [vmem:[%s2109_s20 + $0x18] sm:$0xff] %v874_v18  ;;  %v799_v22 = vadd.f32 %v798_v35, %v767_v55 }
 0x241   : > { %v847_v9 = vpop.f32.mrf.mxu0 }
 0x242   : > { %v822_v12 = vadd.f32 %v821_v41, %v799_v22  ;;  %v848_v27 = vadd.f32 %v847_v9, %v772_v60 }
 0x244   : > { %v873_v36 = vmax.f32 %v822_v12, 0.0  ;;  %v871_v37 = vadd.f32 %v870_v13, %v848_v27 }
 0x246   : > { %1091 = vst [vmem:[%s2109_s20 + $0x10] sm:$0xff] %v873_v36  ;;  %v876_v39 = vmax.f32 %v871_v37, 0.0 }
 0x247   : > { %v801_v54 = vpop.f32.mrf.mxu2  ;;  %v1125_v17 = vld [vmem:[%s2109_s20 + $0x18] sm:$0xff] (%p1430_p4) }
 0x248   : > { %1094 = vst [vmem:[%s2109_s20 + $0x28] sm:$0xff] %v876_v39  ;;  %v802_v57 = vadd.f32 %v801_v54, %v772_v60 }
 0x249   : > { %1126 = vst [vmem:[%s1106_s16 + $0x28] sm:$0xff] (%p1430_p4), %v1125_v17 }
 0x24a   : > { %v825_v28 = vadd.f32 %v824_v25, %v802_v57  ;;  %1103 = sbr.rel (!%p1430_p4) target bundleno = 599 (0x257), region = 52 }
 0x24c   : > { %v875_v14 = vmax.f32 %v825_v28, 0.0 }
 0x24d   : > { %v1123_v32 = vld [vmem:[%s2109_s20 + $0x10] sm:$0xff] (%p1430_p4) }
 0x24e   : > { %1093 = vst [vmem:[%s2109_s20 + $0x20] sm:$0xff] %v875_v14 }
 0x24f   : > { %1124 = vst [vmem:[%s1106_s16 + $0x20] sm:$0xff] %v1123_v32  ;;  %v1129_v44 = vld [vmem:[%s2109_s20 + $0x28] sm:$0xff] }
 0x250   : > { %1130 = vst [vmem:[%s1106_s16 + $0x48] sm:$0xff] %v1129_v44 }
 0x255   : > { %v1127_v38 = vld [vmem:[%s2109_s20 + $0x20] sm:$0xff] }
 0x256   : > { %1128 = vst [vmem:[%s1106_s16 + $0x40] sm:$0xff] %v1127_v38 }
 0x257 PF: > { %p14_p8 = scmp.ge.s32.totalorder %s1420_s28, 4   ;;  %s2376_s24 = smov %s1334_s25 }
 0x258   : > { %s2377_s25 = smov %s1428_s8  ;;  %s2378_s26 = smov %s1420_s28 }
 0x259   :  { %16 = sbr.rel (!%p14_p8) target bundleno = 2 (0x2), region = 101 }

</bundles_post_ra>
